<compile_context>
chip_gen: v7x
topology: tpu7x:2x2x1
jax: 0.10.0
libtpu: 0.0.40
codegen_flags: <defaults>
</compile_context>

<pallas_src>
import jax
import jax.numpy as jnp
from jax.experimental import pallas as pl
from jax.experimental.pallas import tpu as pltpu


# ------------------------------------------------------------------ helpers --

def _erf(x):
    # Abramowitz & Stegun 7.1.26, |err| <= 1.5e-7.  Keeps PyTorch's *exact* GELU
    # semantics to float32-level accuracy; the divide runs on the EUP via
    # pl.reciprocal(approx=True) so it does not load the VALU slots.
    a1, a2, a3, a4, a5 = 0.254829592, -0.284496736, 1.421413741, -1.453152027, 1.061405429
    p = 0.3275911
    ax = jnp.abs(x)
    t = pl.reciprocal(1.0 + p * ax, approx=True)
    poly = ((((a5 * t + a4) * t + a3) * t + a2) * t + a1) * t
    y = 1.0 - poly * jnp.exp(-ax * ax)
    return jnp.where(x >= 0, y, -y)


def _gelu(x):
    return 0.5 * x * (1.0 + _erf(x * 0.7071067811865476))


def _groupnorm(x, gamma, beta, eps=1e-5):
    # nn.GroupNorm(1, C): per-sample normalization over all (C, H*W) elements.
    # x: (C, HW); gamma/beta: (C, 1)
    n = x.shape[0] * x.shape[1]
    mu = jnp.sum(jnp.sum(x, axis=1, keepdims=True), axis=0, keepdims=True) / n
    d = x - mu
    var = jnp.sum(jnp.sum(d * d, axis=1, keepdims=True), axis=0, keepdims=True) / n
    return d * jax.lax.rsqrt(var + eps) * gamma + beta


def _interp_matrix(n_in, n_out):
    # 1-D interpolation matrix for nn.Upsample(scale_factor=2, mode='bilinear',
    # align_corners=True) along one spatial axis:  out = M @ in.
    src = jnp.arange(n_out, dtype=jnp.float32) * (n_in - 1) / max(n_out - 1, 1)
    i0 = jnp.clip(jnp.floor(src).astype(jnp.int32), 0, max(n_in - 2, 0))
    frac = src - i0.astype(jnp.float32)
    rows = jnp.arange(n_out)
    m = jnp.zeros((n_out, n_in), jnp.float32)
    m = m.at[rows, i0].add(1.0 - frac)
    m = m.at[rows, jnp.minimum(i0 + 1, n_in - 1)].add(frac)
    return m


# ------------------------------------------------------------------- module --

def init_up_params(key, in_channels, out_channels):
    """Deterministic parameter init for Up(in_channels, out_channels)."""
    cin, cout = in_channels, out_channels
    cmid2 = cin // 2
    ks = jax.random.split(key, 12)

    def conv_w(k, ci, co):  # HWIO layout, no bias (matches Conv2d(bias=False))
        return 0.1 * jax.random.normal(k, (3, 3, ci, co), jnp.float32)

    def affine(kg, kb, c):  # GroupNorm affine (gamma, beta), stored as (C, 1)
        g = 1.0 + 0.05 * jax.random.normal(kg, (c, 1), jnp.float32)
        b = 0.05 * jax.random.normal(kb, (c, 1), jnp.float32)
        return g, b

    p = {}
    p["w1a"] = conv_w(ks[0], cin, cin)
    p["g1a"], p["b1a"] = affine(ks[1], ks[2], cin)
    p["w1b"] = conv_w(ks[3], cin, cin)
    p["g1b"], p["b1b"] = affine(ks[4], ks[5], cin)
    p["w2a"] = conv_w(ks[6], cin, cmid2)
    p["g2a"], p["b2a"] = affine(ks[7], ks[8], cmid2)
    p["w2b"] = conv_w(ks[9], cmid2, cout)
    p["g2b"], p["b2b"] = affine(ks[10], ks[11], cout)
    return p


def up_forward(x_nchw, skip_nchw, params):
    """Pallas implementation of Up.forward(x, skip_x).  NCHW in, NCHW out."""
    N, C1, Hi, Wi = x_nchw.shape
    Ns, C2, Ho, Wo = skip_nchw.shape
    assert N == Ns and Ho == 2 * Hi and Wo == 2 * Wi
    Cin = C1 + C2           # channel count after torch.cat([skip_x, up(x)], dim=1)
    Cmid2 = Cin // 2        # DoubleConv #2 mid channels
    Cout = params["w2b"].shape[-1]
    HW = Ho * Wo
    L = Wo + 1              # halo width of the flat padded conv buffer

    # ---------------------------- host-side prep (tiny, O(linear) in sizes) ---
    # Separable bilinear(align_corners=True) x2 upsample:  out_c = Mh @ x_c @ Mw^T
    # Two small matrices instead of the previous O((HW)^2) kron matrix.
    mh = _interp_matrix(Hi, Ho)                         # (Ho, Hi)
    mw = _interp_matrix(Wi, Wo)                         # (Wo, Wi)
    mh_b = jnp.broadcast_to(mh, (C1, Ho, Hi))           # batched over channels
    mwT_b = jnp.broadcast_to(mw.T, (C1, Wi, Wo))

    # Column-boundary masks for the 3x3 taps with dw = -1 / +1 (the h/row
    # boundary is handled by the zero halo of the flat padded buffer).
    pcol = jnp.arange(HW, dtype=jnp.int32) % Wo
    masks = jnp.stack([(pcol != 0).astype(jnp.float32),
                       (pcol != Wo - 1).astype(jnp.float32)], axis=0)   # (2, HW)

    # Prefold conv weights HWIO (3,3,ci,co) -> (co, 9*ci): each 3x3 conv becomes a
    # single im2col matmul with contraction K = 9*ci (instead of 9 K=ci matmuls).
    def fold(w):
        return jnp.transpose(w.reshape(-1, w.shape[-1]))

    wf1a, wf1b = fold(params["w1a"]), fold(params["w1b"])
    wf2a, wf2b = fold(params["w2a"]), fold(params["w2b"])

    # Lane-dense skip input: channels ride the sublane dim, flattened H*W rides
    # the lane dim.  NCHW -> (N, C, H*W) is a pure reshape (no wrapper transpose).
    skip2 = skip_nchw.reshape(N, C2, HW)

    # ----------------------------------------------------------------- kernel --
    def kernel(x_ref, skip_ref, mwT_ref, mh_ref, mask_ref,
               w1a_ref, g1a_ref, b1a_ref,
               w1b_ref, g1b_ref, b1b_ref,
               w2a_ref, g2a_ref, b2a_ref,
               w2b_ref, g2b_ref, b2b_ref,
               o_ref, pad_ref):
        # Zero only the 1-element halo of the flat pad buffer (the interior is
        # fully overwritten by every conv).  Done once per grid step (not per
        # conv) so it also stays correct under "parallel" megacore sharding.
        pad_ref[:, pl.ds(0, L)] = jnp.zeros((Cin, L), jnp.float32)
        pad_ref[:, pl.ds(L + HW, L)] = jnp.zeros((Cin, L), jnp.float32)

        mask_l = mask_ref[0:1, :]      # kills w == 0    columns (taps with dw = -1)
        mask_r = mask_ref[1:2, :]      # kills w == Wo-1 columns (taps with dw = +1)

        def conv3x3(zin, wf_ref, ci):
            # 3x3 / stride 1 / pad 1 / no bias on (ci, HW) channels-first data.
            # Write the interior of the zero-halo flat buffer, read the 9 shifted
            # slabs as static lane-offset slices, mask the two column-wrap cases,
            # and do ONE (co, 9*ci) @ (9*ci, HW) MXU matmul (lane-dense output).
            pad_ref[0:ci, pl.ds(L, HW)] = zin
            slabs = []
            for kh in range(3):
                for kw in range(3):
                    s = pad_ref[0:ci, pl.ds(kh * Wo + kw, HW)]
                    if kw == 0:
                        s = s * mask_l
                    elif kw == 2:
                        s = s * mask_r
                    slabs.append(s)
            col = jnp.concatenate(slabs, axis=0)                      # (9*ci, HW)
            return jnp.dot(wf_ref[...], col,
                           preferred_element_type=jnp.float32)        # (co, HW)

        # (1) bilinear x2 upsample (align_corners=True), separable form:
        #     two tiny batched matmuls (batch = channel), no kron matrix.
        x3 = x_ref[0]                                                 # (C1, Hi, Wi)
        t = jnp.einsum('chw,cwW->chW', x3, mwT_ref[...],
                       preferred_element_type=jnp.float32)            # (C1, Hi, Wo)
        u = jnp.einsum('cHh,chW->cHW', mh_ref[...], t,
                       preferred_element_type=jnp.float32)            # (C1, Ho, Wo)
        u = u.reshape(C1, HW)

        # (2) torch.cat([skip_x, x], dim=1): in-register sublane concat.
        z = jnp.concatenate([skip_ref[0], u], axis=0)                 # (Cin, HW)

        # (3) DoubleConv(Cin, Cin, residual=True): conv-GN-GELU-conv-GN, gelu(z + f(z))
        h = conv3x3(z, w1a_ref, Cin)
        h = _gelu(_groupnorm(h, g1a_ref[...], b1a_ref[...]))
        h = conv3x3(h, w1b_ref, Cin)
        h = _groupnorm(h, g1b_ref[...], b1b_ref[...])
        z = _gelu(z + h)

        # TODO(synk): nn.Dropout2d(p=0.3) is treated as identity (inference mode);
        #             training-mode stochastic channel dropout is not implemented.

        # (4) DoubleConv(Cin, Cout, mid=Cin//2): conv-GN-GELU-conv-GN
        h = conv3x3(z, w2a_ref, Cin)
        h = _gelu(_groupnorm(h, g2a_ref[...], b2a_ref[...]))
        h = conv3x3(h, w2b_ref, Cmid2)
        h = _groupnorm(h, g2b_ref[...], b2b_ref[...])

        o_ref[0] = h                                   # (Cout, HW): lane-dense store

    def full(a):  # whole-array block (weights / constants), same for every grid step
        nd = a.ndim
        return pl.BlockSpec(a.shape, lambda n: (0,) * nd)

    grid_spec = pltpu.PrefetchScalarGridSpec(
        num_scalar_prefetch=0,
        grid=(N,),                                  # one sample per grid step; samples are
        in_specs=[                                  # independent -> "parallel" for v7x 2 TCs
            pl.BlockSpec((1, C1, Hi, Wi), lambda n: (n, 0, 0, 0)),   # x (channels-first)
            pl.BlockSpec((1, C2, HW), lambda n: (n, 0, 0)),          # skip_x (lane-dense)
            full(mwT_b), full(mh_b), full(masks),
            full(wf1a), full(params["g1a"]), full(params["b1a"]),
            full(wf1b), full(params["g1b"]), full(params["b1b"]),
            full(wf2a), full(params["g2a"]), full(params["b2a"]),
            full(wf2b), full(params["g2b"]), full(params["b2b"]),
        ],
        out_specs=pl.BlockSpec((1, Cout, HW), lambda n: (n, 0, 0)),  # lane-dense output
        scratch_shapes=[
            # single flat zero-halo conv buffer, reused by all four convs
            pltpu.VMEM((Cin, HW + 2 * L), jnp.float32),
        ],
    )

    # NOTE: whole-image-per-step design; at real UNet resolutions the spatial axis
    # should be row-tiled (1-row halo) to keep the footprint within v7x's 64 MiB VMEM.
    out = pl.pallas_call(
        kernel,
        out_shape=jax.ShapeDtypeStruct((N, Cout, HW), jnp.float32),
        grid_spec=grid_spec,
        compiler_params=pltpu.CompilerParams(
            dimension_semantics=("parallel",),      # shard batch across cores on v7x
            vmem_limit_bytes=32 * 1024 * 1024,
        ),
    )(x_nchw, skip2, mwT_b, mh_b, masks,
      wf1a, params["g1a"], params["b1a"],
      wf1b, params["g1b"], params["b1b"],
      wf2a, params["g2a"], params["b2a"],
      wf2b, params["g2b"], params["b2b"])

    # (C, HW) is already channel-major: plain reshape back to NCHW, no transpose.
    return out.reshape(N, Cout, Ho, Wo)


# --------------------------------------------------------------------- main --

if __name__ == "__main__":
    key = jax.random.PRNGKey(0)
    k_x, k_skip, k_par = jax.random.split(key, 3)

    in_channels, out_channels = 8, 4        # Up(8, 4)
    N, Hi, Wi = 2, 8, 8
    C1 = in_channels // 2                   # channels of x (pre-upsample branch)
    C2 = in_channels - C1                   # channels of the skip connection

    x = jax.random.normal(k_x, (N, C1, Hi, Wi), jnp.float32)                   # NCHW
    skip_x = jax.random.normal(k_skip, (N, C2, 2 * Hi, 2 * Wi), jnp.float32)   # NCHW

    params = init_up_params(k_par, in_channels, out_channels)

    y = up_forward(x, skip_x, params)
    y = jax.block_until_ready(y)

    assert y.shape == (N, out_channels, 2 * Hi, 2 * Wi), y.shape
    assert bool(jnp.all(jnp.isfinite(y)))
    print("KERNEL_OK")
</pallas_src>

<mosaic_0001>
module attributes {stable_mosaic.version = 11 : i64} {
  func.func @kernel(%arg0: i32, %arg1: memref<1x4x8x8xf32, #tpu.memory_space<vmem>>, %arg2: memref<1x4x256xf32, #tpu.memory_space<vmem>>, %arg3: memref<4x8x16xf32, #tpu.memory_space<vmem>>, %arg4: memref<4x16x8xf32, #tpu.memory_space<vmem>>, %arg5: memref<2x256xf32, #tpu.memory_space<vmem>>, %arg6: memref<8x72xf32, #tpu.memory_space<vmem>>, %arg7: memref<8x1xf32, #tpu.memory_space<vmem>>, %arg8: memref<8x1xf32, #tpu.memory_space<vmem>>, %arg9: memref<8x72xf32, #tpu.memory_space<vmem>>, %arg10: memref<8x1xf32, #tpu.memory_space<vmem>>, %arg11: memref<8x1xf32, #tpu.memory_space<vmem>>, %arg12: memref<4x72xf32, #tpu.memory_space<vmem>>, %arg13: memref<4x1xf32, #tpu.memory_space<vmem>>, %arg14: memref<4x1xf32, #tpu.memory_space<vmem>>, %arg15: memref<4x36xf32, #tpu.memory_space<vmem>>, %arg16: memref<4x1xf32, #tpu.memory_space<vmem>>, %arg17: memref<4x1xf32, #tpu.memory_space<vmem>>, %arg18: memref<1x4x256xf32, #tpu.memory_space<vmem>>, %arg19: memref<8x290xf32, #tpu.memory_space<vmem>>) attributes {dimension_semantics = [#tpu.dimension_semantics<parallel>], iteration_bounds = array<i64: 2>, scalar_prefetch = 0 : i64, scratch_operands = 1 : i64, tpu.core_type = #tpu.core_type<tc>, window_params = [{transform_indices = @transform_0, window_bounds = array<i64: 1, 4, 8, 8>}, {transform_indices = @transform_1, window_bounds = array<i64: 1, 4, 256>}, {pipeline_mode = #tpu.pipeline_mode<synchronous>, transform_indices = @transform_2, window_bounds = array<i64: 4, 8, 16>}, {pipeline_mode = #tpu.pipeline_mode<synchronous>, transform_indices = @transform_3, window_bounds = array<i64: 4, 16, 8>}, {pipeline_mode = #tpu.pipeline_mode<synchronous>, transform_indices = @transform_4, window_bounds = array<i64: 2, 256>}, {pipeline_mode = #tpu.pipeline_mode<synchronous>, transform_indices = @transform_5, window_bounds = array<i64: 8, 72>}, {pipeline_mode = #tpu.pipeline_mode<synchronous>, transform_indices = @transform_6, window_bounds = array<i64: 8, 1>}, {pipeline_mode = #tpu.pipeline_mode<synchronous>, transform_indices = @transform_7, window_bounds = array<i64: 8, 1>}, {pipeline_mode = #tpu.pipeline_mode<synchronous>, transform_indices = @transform_8, window_bounds = array<i64: 8, 72>}, {pipeline_mode = #tpu.pipeline_mode<synchronous>, transform_indices = @transform_9, window_bounds = array<i64: 8, 1>}, {pipeline_mode = #tpu.pipeline_mode<synchronous>, transform_indices = @transform_10, window_bounds = array<i64: 8, 1>}, {pipeline_mode = #tpu.pipeline_mode<synchronous>, transform_indices = @transform_11, window_bounds = array<i64: 4, 72>}, {pipeline_mode = #tpu.pipeline_mode<synchronous>, transform_indices = @transform_12, window_bounds = array<i64: 4, 1>}, {pipeline_mode = #tpu.pipeline_mode<synchronous>, transform_indices = @transform_13, window_bounds = array<i64: 4, 1>}, {pipeline_mode = #tpu.pipeline_mode<synchronous>, transform_indices = @transform_14, window_bounds = array<i64: 4, 36>}, {pipeline_mode = #tpu.pipeline_mode<synchronous>, transform_indices = @transform_15, window_bounds = array<i64: 4, 1>}, {pipeline_mode = #tpu.pipeline_mode<synchronous>, transform_indices = @transform_16, window_bounds = array<i64: 4, 1>}, {transform_indices = @transform_17, window_bounds = array<i64: 1, 4, 256>}]} {
    %cst = arith.constant 0.000000e+00 : f32
    %0 = vector.broadcast %cst : f32 to vector<8x17xf32>
    %c0 = arith.constant 0 : index
    %c0_0 = arith.constant 0 : index
    %1 = vector.load %arg19[%c0, %c0_0] : memref<8x290xf32, #tpu.memory_space<vmem>>, vector<8x17xf32>
    tpu.vector_store %arg19[%c0, %c0_0], %0 {strides = array<i32>} : memref<8x290xf32, #tpu.memory_space<vmem>>, vector<8x17xf32>,
    %cst_1 = arith.constant 0.000000e+00 : f32
    %2 = vector.broadcast %cst_1 : f32 to vector<8x17xf32>
    %c0_2 = arith.constant 0 : index
    %c273 = arith.constant 273 : index
    %3 = vector.load %arg19[%c0_2, %c273] : memref<8x290xf32, #tpu.memory_space<vmem>>, vector<8x17xf32>
    tpu.vector_store %arg19[%c0_2, %c273], %2 {strides = array<i32>} : memref<8x290xf32, #tpu.memory_space<vmem>>, vector<8x17xf32>,
    %c0_3 = arith.constant 0 : index
    %c0_4 = arith.constant 0 : index
    %4 = vector.load %arg5[%c0_3, %c0_4] : memref<2x256xf32, #tpu.memory_space<vmem>>, vector<1x256xf32>
    %c1 = arith.constant 1 : index
    %c0_5 = arith.constant 0 : index
    %5 = vector.load %arg5[%c1, %c0_5] : memref<2x256xf32, #tpu.memory_space<vmem>>, vector<1x256xf32>
    %c0_6 = arith.constant 0 : index
    %c0_7 = arith.constant 0 : index
    %c0_8 = arith.constant 0 : index
    %c0_9 = arith.constant 0 : index
    %6 = vector.load %arg1[%c0_6, %c0_7, %c0_8, %c0_9] : memref<1x4x8x8xf32, #tpu.memory_space<vmem>>, vector<1x4x8x8xf32>
    %7 = vector.shape_cast %6 : vector<1x4x8x8xf32> to vector<4x8x8xf32>
    %c0_10 = arith.constant 0 : index
    %c0_11 = arith.constant 0 : index
    %c0_12 = arith.constant 0 : index
    %8 = vector.load %arg3[%c0_10, %c0_11, %c0_12] : memref<4x8x16xf32, #tpu.memory_space<vmem>>, vector<4x8x16xf32>
    "tpu.trace_start"() <{level = 10 : i32, message = "chw,cwW->chW"}> : () -> ()
    %cst_13 = arith.constant dense<0.000000e+00> : vector<4x8x16xf32>
    %9 = tpu.matmul %7, %8, %cst_13 {dimension_numbers = #tpu.dot_dimension_numbers<[2], [1], [1], [2], [0, 0, 0, 1, 1, 2], [0], [0]>} : vector<4x8x8xf32>, vector<4x8x16xf32>, vector<4x8x16xf32> -> vector<4x8x16xf32>
    "tpu.trace_stop"() : () -> ()
    %c0_14 = arith.constant 0 : index
    %c0_15 = arith.constant 0 : index
    %c0_16 = arith.constant 0 : index
    %10 = vector.load %arg4[%c0_14, %c0_15, %c0_16] : memref<4x16x8xf32, #tpu.memory_space<vmem>>, vector<4x16x8xf32>
    "tpu.trace_start"() <{level = 10 : i32, message = "cHh,chW->cHW"}> : () -> ()
    %cst_17 = arith.constant dense<0.000000e+00> : vector<4x16x16xf32>
    %11 = tpu.matmul %10, %9, %cst_17 {dimension_numbers = #tpu.dot_dimension_numbers<[2], [1], [1], [2], [0, 0, 0, 1, 1, 2], [0], [0]>} : vector<4x16x8xf32>, vector<4x8x16xf32>, vector<4x16x16xf32> -> vector<4x16x16xf32>
    "tpu.trace_stop"() : () -> ()
    %12 = vector.shape_cast %11 : vector<4x16x16xf32> to vector<4x256xf32>
    %c0_18 = arith.constant 0 : index
    %c0_19 = arith.constant 0 : index
    %c0_20 = arith.constant 0 : index
    %13 = vector.load %arg2[%c0_18, %c0_19, %c0_20] : memref<1x4x256xf32, #tpu.memory_space<vmem>>, vector<1x4x256xf32>
    %14 = vector.shape_cast %13 : vector<1x4x256xf32> to vector<4x256xf32>
    %15 = tpu.concatenate %14, %12 in 0 : vector<4x256xf32>, vector<4x256xf32> -> vector<8x256xf32>
    %c0_21 = arith.constant 0 : index
    %c17 = arith.constant 17 : index
    %16 = vector.load %arg19[%c0_21, %c17] : memref<8x290xf32, #tpu.memory_space<vmem>>, vector<8x256xf32>
    tpu.vector_store %arg19[%c0_21, %c17], %15 {strides = array<i32>} : memref<8x290xf32, #tpu.memory_space<vmem>>, vector<8x256xf32>,
    %c0_22 = arith.constant 0 : index
    %c0_23 = arith.constant 0 : index
    %17 = vector.load %arg19[%c0_22, %c0_23] : memref<8x290xf32, #tpu.memory_space<vmem>>, vector<8x256xf32>
    %18 = vector.broadcast %4 : vector<1x256xf32> to vector<8x256xf32>
    %19 = arith.mulf %17, %18 : vector<8x256xf32>
    %c0_24 = arith.constant 0 : index
    %c1_25 = arith.constant 1 : index
    %20 = vector.load %arg19[%c0_24, %c1_25] : memref<8x290xf32, #tpu.memory_space<vmem>>, vector<8x256xf32>
    %c0_26 = arith.constant 0 : index
    %c2 = arith.constant 2 : index
    %21 = vector.load %arg19[%c0_26, %c2] : memref<8x290xf32, #tpu.memory_space<vmem>>, vector<8x256xf32>
    %22 = vector.broadcast %5 : vector<1x256xf32> to vector<8x256xf32>
    %23 = arith.mulf %21, %22 : vector<8x256xf32>
    %c0_27 = arith.constant 0 : index
    %c16 = arith.constant 16 : index
    %24 = vector.load %arg19[%c0_27, %c16] : memref<8x290xf32, #tpu.memory_space<vmem>>, vector<8x256xf32>
    %25 = vector.broadcast %4 : vector<1x256xf32> to vector<8x256xf32>
    %26 = arith.mulf %24, %25 : vector<8x256xf32>
    %c0_28 = arith.constant 0 : index
    %c17_29 = arith.constant 17 : index
    %27 = vector.load %arg19[%c0_28, %c17_29] : memref<8x290xf32, #tpu.memory_space<vmem>>, vector<8x256xf32>
    %c0_30 = arith.constant 0 : index
    %c18 = arith.constant 18 : index
    %28 = vector.load %arg19[%c0_30, %c18] : memref<8x290xf32, #tpu.memory_space<vmem>>, vector<8x256xf32>
    %29 = vector.broadcast %5 : vector<1x256xf32> to vector<8x256xf32>
    %30 = arith.mulf %28, %29 : vector<8x256xf32>
    %c0_31 = arith.constant 0 : index
    %c32 = arith.constant 32 : index
    %31 = vector.load %arg19[%c0_31, %c32] : memref<8x290xf32, #tpu.memory_space<vmem>>, vector<8x256xf32>
    %32 = vector.broadcast %4 : vector<1x256xf32> to vector<8x256xf32>
    %33 = arith.mulf %31, %32 : vector<8x256xf32>
    %c0_32 = arith.constant 0 : index
    %c33 = arith.constant 33 : index
    %34 = vector.load %arg19[%c0_32, %c33] : memref<8x290xf32, #tpu.memory_space<vmem>>, vector<8x256xf32>
    %c0_33 = arith.constant 0 : index
    %c34 = arith.constant 34 : index
    %35 = vector.load %arg19[%c0_33, %c34] : memref<8x290xf32, #tpu.memory_space<vmem>>, vector<8x256xf32>
    %36 = vector.broadcast %5 : vector<1x256xf32> to vector<8x256xf32>
    %37 = arith.mulf %35, %36 : vector<8x256xf32>
    %38 = tpu.concatenate %19, %20, %23, %26, %27, %30, %33, %34, %37 in 0 : vector<8x256xf32>, vector<8x256xf32>, vector<8x256xf32>, vector<8x256xf32>, vector<8x256xf32>, vector<8x256xf32>, vector<8x256xf32>, vector<8x256xf32>, vector<8x256xf32> -> vector<72x256xf32>
    %c0_34 = arith.constant 0 : index
    %c0_35 = arith.constant 0 : index
    %39 = vector.load %arg6[%c0_34, %c0_35] : memref<8x72xf32, #tpu.memory_space<vmem>>, vector<8x72xf32>
    %cst_36 = arith.constant dense<0.000000e+00> : vector<8x256xf32>
    %40 = tpu.matmul %39, %38, %cst_36 {dimension_numbers = #tpu.dot_dimension_numbers<[1], [0], [0], [1], [0, 0, 1, 1], [], []>} : vector<8x72xf32>, vector<72x256xf32>, vector<8x256xf32> -> vector<8x256xf32>
    %c0_37 = arith.constant 0 : index
    %c0_38 = arith.constant 0 : index
    %41 = vector.load %arg7[%c0_37, %c0_38] : memref<8x1xf32, #tpu.memory_space<vmem>>, vector<8x1xf32>
    %c0_39 = arith.constant 0 : index
    %c0_40 = arith.constant 0 : index
    %42 = vector.load %arg8[%c0_39, %c0_40] : memref<8x1xf32, #tpu.memory_space<vmem>>, vector<8x1xf32>
    %cst_41 = arith.constant dense<0.000000e+00> : vector<8xf32>
    %43 = vector.multi_reduction <add>, %40, %cst_41 [1] : vector<8x256xf32> to vector<8xf32>
    %44 = vector.shape_cast %43 : vector<8xf32> to vector<8x1xf32>
    %cst_42 = arith.constant dense<0.000000e+00> : vector<1xf32>
    %45 = vector.multi_reduction <add>, %44, %cst_42 [0] : vector<8x1xf32> to vector<1xf32>
    %46 = vector.shape_cast %45 : vector<1xf32> to vector<1x1xf32>
    %cst_43 = arith.constant 2.048000e+03 : f32
    %47 = vector.broadcast %cst_43 : f32 to vector<1x1xf32>
    %48 = arith.divf %46, %47 : vector<1x1xf32>
    %49 = vector.broadcast %48 : vector<1x1xf32> to vector<8x256xf32>
    %50 = arith.subf %40, %49 : vector<8x256xf32>
    %51 = arith.mulf %50, %50 : vector<8x256xf32>
    %cst_44 = arith.constant dense<0.000000e+00> : vector<8xf32>
    %52 = vector.multi_reduction <add>, %51, %cst_44 [1] : vector<8x256xf32> to vector<8xf32>
    %53 = vector.shape_cast %52 : vector<8xf32> to vector<8x1xf32>
    %cst_45 = arith.constant dense<0.000000e+00> : vector<1xf32>
    %54 = vector.multi_reduction <add>, %53, %cst_45 [0] : vector<8x1xf32> to vector<1xf32>
    %55 = vector.shape_cast %54 : vector<1xf32> to vector<1x1xf32>
    %cst_46 = arith.constant 2.048000e+03 : f32
    %56 = vector.broadcast %cst_46 : f32 to vector<1x1xf32>
    %57 = arith.divf %55, %56 : vector<1x1xf32>
    %cst_47 = arith.constant 9.99999974E-6 : f32
    %58 = vector.broadcast %cst_47 : f32 to vector<1x1xf32>
    %59 = arith.addf %57, %58 : vector<1x1xf32>
    %60 = math.rsqrt %59 : vector<1x1xf32>
    %61 = vector.broadcast %60 : vector<1x1xf32> to vector<8x256xf32>
    %62 = arith.mulf %50, %61 : vector<8x256xf32>
    %63 = vector.broadcast %41 : vector<8x1xf32> to vector<8x256xf32>
    %64 = arith.mulf %62, %63 : vector<8x256xf32>
    %65 = vector.broadcast %42 : vector<8x1xf32> to vector<8x256xf32>
    %66 = arith.addf %64, %65 : vector<8x256xf32>
    %cst_48 = arith.constant 5.000000e-01 : f32
    %67 = vector.broadcast %cst_48 : f32 to vector<8x256xf32>
    %68 = arith.mulf %67, %66 : vector<8x256xf32>
    %cst_49 = arith.constant 0.707106769 : f32
    %69 = vector.broadcast %cst_49 : f32 to vector<8x256xf32>
    %70 = arith.mulf %66, %69 : vector<8x256xf32>
    %71 = math.absf %70 : vector<8x256xf32>
    %cst_50 = arith.constant 0.327591091 : f32
    %72 = vector.broadcast %cst_50 : f32 to vector<8x256xf32>
    %73 = arith.mulf %72, %71 : vector<8x256xf32>
    %cst_51 = arith.constant 1.000000e+00 : f32
    %74 = vector.broadcast %cst_51 : f32 to vector<8x256xf32>
    %75 = arith.addf %74, %73 : vector<8x256xf32>
    %76 = tpu.reciprocal %75 {approx = true} : vector<8x256xf32> -> vector<8x256xf32>
    %cst_52 = arith.constant 1.06140542 : f32
    %77 = vector.broadcast %cst_52 : f32 to vector<8x256xf32>
    %78 = arith.mulf %77, %76 : vector<8x256xf32>
    %cst_53 = arith.constant -1.45315206 : f32
    %79 = vector.broadcast %cst_53 : f32 to vector<8x256xf32>
    %80 = arith.addf %78, %79 : vector<8x256xf32>
    %81 = arith.mulf %80, %76 : vector<8x256xf32>
    %cst_54 = arith.constant 1.42141378 : f32
    %82 = vector.broadcast %cst_54 : f32 to vector<8x256xf32>
    %83 = arith.addf %81, %82 : vector<8x256xf32>
    %84 = arith.mulf %83, %76 : vector<8x256xf32>
    %cst_55 = arith.constant -0.284496725 : f32
    %85 = vector.broadcast %cst_55 : f32 to vector<8x256xf32>
    %86 = arith.addf %84, %85 : vector<8x256xf32>
    %87 = arith.mulf %86, %76 : vector<8x256xf32>
    %cst_56 = arith.constant 0.254829586 : f32
    %88 = vector.broadcast %cst_56 : f32 to vector<8x256xf32>
    %89 = arith.addf %87, %88 : vector<8x256xf32>
    %90 = arith.mulf %89, %76 : vector<8x256xf32>
    %cst_57 = arith.constant 0.000000e+00 : f32
    %91 = vector.broadcast %cst_57 : f32 to vector<8x256xf32>
    %92 = arith.subf %91, %71 : vector<8x256xf32>
    %93 = arith.mulf %92, %71 : vector<8x256xf32>
    %94 = math.exp %93 : vector<8x256xf32>
    %95 = arith.mulf %90, %94 : vector<8x256xf32>
    %cst_58 = arith.constant 1.000000e+00 : f32
    %96 = vector.broadcast %cst_58 : f32 to vector<8x256xf32>
    %97 = arith.subf %96, %95 : vector<8x256xf32>
    %cst_59 = arith.constant 0.000000e+00 : f32
    %98 = vector.broadcast %cst_59 : f32 to vector<8x256xf32>
    %99 = arith.cmpf oge, %70, %98 : vector<8x256xf32>
    %cst_60 = arith.constant 0.000000e+00 : f32
    %100 = vector.broadcast %cst_60 : f32 to vector<8x256xf32>
    %101 = arith.subf %100, %97 : vector<8x256xf32>
    %102 = arith.select %99, %97, %101 : vector<8x256xi1>, vector<8x256xf32>
    %cst_61 = arith.constant 1.000000e+00 : f32
    %103 = vector.broadcast %cst_61 : f32 to vector<8x256xf32>
    %104 = arith.addf %103, %102 : vector<8x256xf32>
    %105 = arith.mulf %68, %104 : vector<8x256xf32>
    %c0_62 = arith.constant 0 : index
    %c17_63 = arith.constant 17 : index
    %106 = vector.load %arg19[%c0_62, %c17_63] : memref<8x290xf32, #tpu.memory_space<vmem>>, vector<8x256xf32>
    tpu.vector_store %arg19[%c0_62, %c17_63], %105 {strides = array<i32>} : memref<8x290xf32, #tpu.memory_space<vmem>>, vector<8x256xf32>,
    %c0_64 = arith.constant 0 : index
    %c0_65 = arith.constant 0 : index
    %107 = vector.load %arg19[%c0_64, %c0_65] : memref<8x290xf32, #tpu.memory_space<vmem>>, vector<8x256xf32>
    %108 = vector.broadcast %4 : vector<1x256xf32> to vector<8x256xf32>
    %109 = arith.mulf %107, %108 : vector<8x256xf32>
    %c0_66 = arith.constant 0 : index
    %c1_67 = arith.constant 1 : index
    %110 = vector.load %arg19[%c0_66, %c1_67] : memref<8x290xf32, #tpu.memory_space<vmem>>, vector<8x256xf32>
    %c0_68 = arith.constant 0 : index
    %c2_69 = arith.constant 2 : index
    %111 = vector.load %arg19[%c0_68, %c2_69] : memref<8x290xf32, #tpu.memory_space<vmem>>, vector<8x256xf32>
    %112 = vector.broadcast %5 : vector<1x256xf32> to vector<8x256xf32>
    %113 = arith.mulf %111, %112 : vector<8x256xf32>
    %c0_70 = arith.constant 0 : index
    %c16_71 = arith.constant 16 : index
    %114 = vector.load %arg19[%c0_70, %c16_71] : memref<8x290xf32, #tpu.memory_space<vmem>>, vector<8x256xf32>
    %115 = vector.broadcast %4 : vector<1x256xf32> to vector<8x256xf32>
    %116 = arith.mulf %114, %115 : vector<8x256xf32>
    %c0_72 = arith.constant 0 : index
    %c17_73 = arith.constant 17 : index
    %117 = vector.load %arg19[%c0_72, %c17_73] : memref<8x290xf32, #tpu.memory_space<vmem>>, vector<8x256xf32>
    %c0_74 = arith.constant 0 : index
    %c18_75 = arith.constant 18 : index
    %118 = vector.load %arg19[%c0_74, %c18_75] : memref<8x290xf32, #tpu.memory_space<vmem>>, vector<8x256xf32>
    %119 = vector.broadcast %5 : vector<1x256xf32> to vector<8x256xf32>
    %120 = arith.mulf %118, %119 : vector<8x256xf32>
    %c0_76 = arith.constant 0 : index
    %c32_77 = arith.constant 32 : index
    %121 = vector.load %arg19[%c0_76, %c32_77] : memref<8x290xf32, #tpu.memory_space<vmem>>, vector<8x256xf32>
    %122 = vector.broadcast %4 : vector<1x256xf32> to vector<8x256xf32>
    %123 = arith.mulf %121, %122 : vector<8x256xf32>
    %c0_78 = arith.constant 0 : index
    %c33_79 = arith.constant 33 : index
    %124 = vector.load %arg19[%c0_78, %c33_79] : memref<8x290xf32, #tpu.memory_space<vmem>>, vector<8x256xf32>
    %c0_80 = arith.constant 0 : index
    %c34_81 = arith.constant 34 : index
    %125 = vector.load %arg19[%c0_80, %c34_81] : memref<8x290xf32, #tpu.memory_space<vmem>>, vector<8x256xf32>
    %126 = vector.broadcast %5 : vector<1x256xf32> to vector<8x256xf32>
    %127 = arith.mulf %125, %126 : vector<8x256xf32>
    %128 = tpu.concatenate %109, %110, %113, %116, %117, %120, %123, %124, %127 in 0 : vector<8x256xf32>, vector<8x256xf32>, vector<8x256xf32>, vector<8x256xf32>, vector<8x256xf32>, vector<8x256xf32>, vector<8x256xf32>, vector<8x256xf32>, vector<8x256xf32> -> vector<72x256xf32>
    %c0_82 = arith.constant 0 : index
    %c0_83 = arith.constant 0 : index
    %129 = vector.load %arg9[%c0_82, %c0_83] : memref<8x72xf32, #tpu.memory_space<vmem>>, vector<8x72xf32>
    %cst_84 = arith.constant dense<0.000000e+00> : vector<8x256xf32>
    %130 = tpu.matmul %129, %128, %cst_84 {dimension_numbers = #tpu.dot_dimension_numbers<[1], [0], [0], [1], [0, 0, 1, 1], [], []>} : vector<8x72xf32>, vector<72x256xf32>, vector<8x256xf32> -> vector<8x256xf32>
    %c0_85 = arith.constant 0 : index
    %c0_86 = arith.constant 0 : index
    %131 = vector.load %arg10[%c0_85, %c0_86] : memref<8x1xf32, #tpu.memory_space<vmem>>, vector<8x1xf32>
    %c0_87 = arith.constant 0 : index
    %c0_88 = arith.constant 0 : index
    %132 = vector.load %arg11[%c0_87, %c0_88] : memref<8x1xf32, #tpu.memory_space<vmem>>, vector<8x1xf32>
    %cst_89 = arith.constant dense<0.000000e+00> : vector<8xf32>
    %133 = vector.multi_reduction <add>, %130, %cst_89 [1] : vector<8x256xf32> to vector<8xf32>
    %134 = vector.shape_cast %133 : vector<8xf32> to vector<8x1xf32>
    %cst_90 = arith.constant dense<0.000000e+00> : vector<1xf32>
    %135 = vector.multi_reduction <add>, %134, %cst_90 [0] : vector<8x1xf32> to vector<1xf32>
    %136 = vector.shape_cast %135 : vector<1xf32> to vector<1x1xf32>
    %cst_91 = arith.constant 2.048000e+03 : f32
    %137 = vector.broadcast %cst_91 : f32 to vector<1x1xf32>
    %138 = arith.divf %136, %137 : vector<1x1xf32>
    %139 = vector.broadcast %138 : vector<1x1xf32> to vector<8x256xf32>
    %140 = arith.subf %130, %139 : vector<8x256xf32>
    %141 = arith.mulf %140, %140 : vector<8x256xf32>
    %cst_92 = arith.constant dense<0.000000e+00> : vector<8xf32>
    %142 = vector.multi_reduction <add>, %141, %cst_92 [1] : vector<8x256xf32> to vector<8xf32>
    %143 = vector.shape_cast %142 : vector<8xf32> to vector<8x1xf32>
    %cst_93 = arith.constant dense<0.000000e+00> : vector<1xf32>
    %144 = vector.multi_reduction <add>, %143, %cst_93 [0] : vector<8x1xf32> to vector<1xf32>
    %145 = vector.shape_cast %144 : vector<1xf32> to vector<1x1xf32>
    %cst_94 = arith.constant 2.048000e+03 : f32
    %146 = vector.broadcast %cst_94 : f32 to vector<1x1xf32>
    %147 = arith.divf %145, %146 : vector<1x1xf32>
    %cst_95 = arith.constant 9.99999974E-6 : f32
    %148 = vector.broadcast %cst_95 : f32 to vector<1x1xf32>
    %149 = arith.addf %147, %148 : vector<1x1xf32>
    %150 = math.rsqrt %149 : vector<1x1xf32>
    %151 = vector.broadcast %150 : vector<1x1xf32> to vector<8x256xf32>
    %152 = arith.mulf %140, %151 : vector<8x256xf32>
    %153 = vector.broadcast %131 : vector<8x1xf32> to vector<8x256xf32>
    %154 = arith.mulf %152, %153 : vector<8x256xf32>
    %155 = vector.broadcast %132 : vector<8x1xf32> to vector<8x256xf32>
    %156 = arith.addf %154, %155 : vector<8x256xf32>
    %157 = arith.addf %15, %156 : vector<8x256xf32>
    %cst_96 = arith.constant 5.000000e-01 : f32
    %158 = vector.broadcast %cst_96 : f32 to vector<8x256xf32>
    %159 = arith.mulf %158, %157 : vector<8x256xf32>
    %cst_97 = arith.constant 0.707106769 : f32
    %160 = vector.broadcast %cst_97 : f32 to vector<8x256xf32>
    %161 = arith.mulf %157, %160 : vector<8x256xf32>
    %162 = math.absf %161 : vector<8x256xf32>
    %cst_98 = arith.constant 0.327591091 : f32
    %163 = vector.broadcast %cst_98 : f32 to vector<8x256xf32>
    %164 = arith.mulf %163, %162 : vector<8x256xf32>
    %cst_99 = arith.constant 1.000000e+00 : f32
    %165 = vector.broadcast %cst_99 : f32 to vector<8x256xf32>
    %166 = arith.addf %165, %164 : vector<8x256xf32>
    %167 = tpu.reciprocal %166 {approx = true} : vector<8x256xf32> -> vector<8x256xf32>
    %cst_100 = arith.constant 1.06140542 : f32
    %168 = vector.broadcast %cst_100 : f32 to vector<8x256xf32>
    %169 = arith.mulf %168, %167 : vector<8x256xf32>
    %cst_101 = arith.constant -1.45315206 : f32
    %170 = vector.broadcast %cst_101 : f32 to vector<8x256xf32>
    %171 = arith.addf %169, %170 : vector<8x256xf32>
    %172 = arith.mulf %171, %167 : vector<8x256xf32>
    %cst_102 = arith.constant 1.42141378 : f32
    %173 = vector.broadcast %cst_102 : f32 to vector<8x256xf32>
    %174 = arith.addf %172, %173 : vector<8x256xf32>
    %175 = arith.mulf %174, %167 : vector<8x256xf32>
    %cst_103 = arith.constant -0.284496725 : f32
    %176 = vector.broadcast %cst_103 : f32 to vector<8x256xf32>
    %177 = arith.addf %175, %176 : vector<8x256xf32>
    %178 = arith.mulf %177, %167 : vector<8x256xf32>
    %cst_104 = arith.constant 0.254829586 : f32
    %179 = vector.broadcast %cst_104 : f32 to vector<8x256xf32>
    %180 = arith.addf %178, %179 : vector<8x256xf32>
    %181 = arith.mulf %180, %167 : vector<8x256xf32>
    %cst_105 = arith.constant 0.000000e+00 : f32
    %182 = vector.broadcast %cst_105 : f32 to vector<8x256xf32>
    %183 = arith.subf %182, %162 : vector<8x256xf32>
    %184 = arith.mulf %183, %162 : vector<8x256xf32>
    %185 = math.exp %184 : vector<8x256xf32>
    %186 = arith.mulf %181, %185 : vector<8x256xf32>
    %cst_106 = arith.constant 1.000000e+00 : f32
    %187 = vector.broadcast %cst_106 : f32 to vector<8x256xf32>
    %188 = arith.subf %187, %186 : vector<8x256xf32>
    %cst_107 = arith.constant 0.000000e+00 : f32
    %189 = vector.broadcast %cst_107 : f32 to vector<8x256xf32>
    %190 = arith.cmpf oge, %161, %189 : vector<8x256xf32>
    %cst_108 = arith.constant 0.000000e+00 : f32
    %191 = vector.broadcast %cst_108 : f32 to vector<8x256xf32>
    %192 = arith.subf %191, %188 : vector<8x256xf32>
    %193 = arith.select %190, %188, %192 : vector<8x256xi1>, vector<8x256xf32>
    %cst_109 = arith.constant 1.000000e+00 : f32
    %194 = vector.broadcast %cst_109 : f32 to vector<8x256xf32>
    %195 = arith.addf %194, %193 : vector<8x256xf32>
    %196 = arith.mulf %159, %195 : vector<8x256xf32>
    %c0_110 = arith.constant 0 : index
    %c17_111 = arith.constant 17 : index
    %197 = vector.load %arg19[%c0_110, %c17_111] : memref<8x290xf32, #tpu.memory_space<vmem>>, vector<8x256xf32>
    tpu.vector_store %arg19[%c0_110, %c17_111], %196 {strides = array<i32>} : memref<8x290xf32, #tpu.memory_space<vmem>>, vector<8x256xf32>,
    %c0_112 = arith.constant 0 : index
    %c0_113 = arith.constant 0 : index
    %198 = vector.load %arg19[%c0_112, %c0_113] : memref<8x290xf32, #tpu.memory_space<vmem>>, vector<8x256xf32>
    %199 = vector.broadcast %4 : vector<1x256xf32> to vector<8x256xf32>
    %200 = arith.mulf %198, %199 : vector<8x256xf32>
    %c0_114 = arith.constant 0 : index
    %c1_115 = arith.constant 1 : index
    %201 = vector.load %arg19[%c0_114, %c1_115] : memref<8x290xf32, #tpu.memory_space<vmem>>, vector<8x256xf32>
    %c0_116 = arith.constant 0 : index
    %c2_117 = arith.constant 2 : index
    %202 = vector.load %arg19[%c0_116, %c2_117] : memref<8x290xf32, #tpu.memory_space<vmem>>, vector<8x256xf32>
    %203 = vector.broadcast %5 : vector<1x256xf32> to vector<8x256xf32>
    %204 = arith.mulf %202, %203 : vector<8x256xf32>
    %c0_118 = arith.constant 0 : index
    %c16_119 = arith.constant 16 : index
    %205 = vector.load %arg19[%c0_118, %c16_119] : memref<8x290xf32, #tpu.memory_space<vmem>>, vector<8x256xf32>
    %206 = vector.broadcast %4 : vector<1x256xf32> to vector<8x256xf32>
    %207 = arith.mulf %205, %206 : vector<8x256xf32>
    %c0_120 = arith.constant 0 : index
    %c17_121 = arith.constant 17 : index
    %208 = vector.load %arg19[%c0_120, %c17_121] : memref<8x290xf32, #tpu.memory_space<vmem>>, vector<8x256xf32>
    %c0_122 = arith.constant 0 : index
    %c18_123 = arith.constant 18 : index
    %209 = vector.load %arg19[%c0_122, %c18_123] : memref<8x290xf32, #tpu.memory_space<vmem>>, vector<8x256xf32>
    %210 = vector.broadcast %5 : vector<1x256xf32> to vector<8x256xf32>
    %211 = arith.mulf %209, %210 : vector<8x256xf32>
    %c0_124 = arith.constant 0 : index
    %c32_125 = arith.constant 32 : index
    %212 = vector.load %arg19[%c0_124, %c32_125] : memref<8x290xf32, #tpu.memory_space<vmem>>, vector<8x256xf32>
    %213 = vector.broadcast %4 : vector<1x256xf32> to vector<8x256xf32>
    %214 = arith.mulf %212, %213 : vector<8x256xf32>
    %c0_126 = arith.constant 0 : index
    %c33_127 = arith.constant 33 : index
    %215 = vector.load %arg19[%c0_126, %c33_127] : memref<8x290xf32, #tpu.memory_space<vmem>>, vector<8x256xf32>
    %c0_128 = arith.constant 0 : index
    %c34_129 = arith.constant 34 : index
    %216 = vector.load %arg19[%c0_128, %c34_129] : memref<8x290xf32, #tpu.memory_space<vmem>>, vector<8x256xf32>
    %217 = vector.broadcast %5 : vector<1x256xf32> to vector<8x256xf32>
    %218 = arith.mulf %216, %217 : vector<8x256xf32>
    %219 = tpu.concatenate %200, %201, %204, %207, %208, %211, %214, %215, %218 in 0 : vector<8x256xf32>, vector<8x256xf32>, vector<8x256xf32>, vector<8x256xf32>, vector<8x256xf32>, vector<8x256xf32>, vector<8x256xf32>, vector<8x256xf32>, vector<8x256xf32> -> vector<72x256xf32>
    %c0_130 = arith.constant 0 : index
    %c0_131 = arith.constant 0 : index
    %220 = vector.load %arg12[%c0_130, %c0_131] : memref<4x72xf32, #tpu.memory_space<vmem>>, vector<4x72xf32>
    %cst_132 = arith.constant dense<0.000000e+00> : vector<4x256xf32>
    %221 = tpu.matmul %220, %219, %cst_132 {dimension_numbers = #tpu.dot_dimension_numbers<[1], [0], [0], [1], [0, 0, 1, 1], [], []>} : vector<4x72xf32>, vector<72x256xf32>, vector<4x256xf32> -> vector<4x256xf32>
    %c0_133 = arith.constant 0 : index
    %c0_134 = arith.constant 0 : index
    %222 = vector.load %arg13[%c0_133, %c0_134] : memref<4x1xf32, #tpu.memory_space<vmem>>, vector<4x1xf32>
    %c0_135 = arith.constant 0 : index
    %c0_136 = arith.constant 0 : index
    %223 = vector.load %arg14[%c0_135, %c0_136] : memref<4x1xf32, #tpu.memory_space<vmem>>, vector<4x1xf32>
    %cst_137 = arith.constant dense<0.000000e+00> : vector<4xf32>
    %224 = vector.multi_reduction <add>, %221, %cst_137 [1] : vector<4x256xf32> to vector<4xf32>
    %225 = vector.shape_cast %224 : vector<4xf32> to vector<4x1xf32>
    %cst_138 = arith.constant dense<0.000000e+00> : vector<1xf32>
    %226 = vector.multi_reduction <add>, %225, %cst_138 [0] : vector<4x1xf32> to vector<1xf32>
    %227 = vector.shape_cast %226 : vector<1xf32> to vector<1x1xf32>
    %cst_139 = arith.constant 1.024000e+03 : f32
    %228 = vector.broadcast %cst_139 : f32 to vector<1x1xf32>
    %229 = arith.divf %227, %228 : vector<1x1xf32>
    %230 = vector.broadcast %229 : vector<1x1xf32> to vector<4x256xf32>
    %231 = arith.subf %221, %230 : vector<4x256xf32>
    %232 = arith.mulf %231, %231 : vector<4x256xf32>
    %cst_140 = arith.constant dense<0.000000e+00> : vector<4xf32>
    %233 = vector.multi_reduction <add>, %232, %cst_140 [1] : vector<4x256xf32> to vector<4xf32>
    %234 = vector.shape_cast %233 : vector<4xf32> to vector<4x1xf32>
    %cst_141 = arith.constant dense<0.000000e+00> : vector<1xf32>
    %235 = vector.multi_reduction <add>, %234, %cst_141 [0] : vector<4x1xf32> to vector<1xf32>
    %236 = vector.shape_cast %235 : vector<1xf32> to vector<1x1xf32>
    %cst_142 = arith.constant 1.024000e+03 : f32
    %237 = vector.broadcast %cst_142 : f32 to vector<1x1xf32>
    %238 = arith.divf %236, %237 : vector<1x1xf32>
    %cst_143 = arith.constant 9.99999974E-6 : f32
    %239 = vector.broadcast %cst_143 : f32 to vector<1x1xf32>
    %240 = arith.addf %238, %239 : vector<1x1xf32>
    %241 = math.rsqrt %240 : vector<1x1xf32>
    %242 = vector.broadcast %241 : vector<1x1xf32> to vector<4x256xf32>
    %243 = arith.mulf %231, %242 : vector<4x256xf32>
    %244 = vector.broadcast %222 : vector<4x1xf32> to vector<4x256xf32>
    %245 = arith.mulf %243, %244 : vector<4x256xf32>
    %246 = vector.broadcast %223 : vector<4x1xf32> to vector<4x256xf32>
    %247 = arith.addf %245, %246 : vector<4x256xf32>
    %cst_144 = arith.constant 5.000000e-01 : f32
    %248 = vector.broadcast %cst_144 : f32 to vector<4x256xf32>
    %249 = arith.mulf %248, %247 : vector<4x256xf32>
    %cst_145 = arith.constant 0.707106769 : f32
    %250 = vector.broadcast %cst_145 : f32 to vector<4x256xf32>
    %251 = arith.mulf %247, %250 : vector<4x256xf32>
    %252 = math.absf %251 : vector<4x256xf32>
    %cst_146 = arith.constant 0.327591091 : f32
    %253 = vector.broadcast %cst_146 : f32 to vector<4x256xf32>
    %254 = arith.mulf %253, %252 : vector<4x256xf32>
    %cst_147 = arith.constant 1.000000e+00 : f32
    %255 = vector.broadcast %cst_147 : f32 to vector<4x256xf32>
    %256 = arith.addf %255, %254 : vector<4x256xf32>
    %257 = tpu.reciprocal %256 {approx = true} : vector<4x256xf32> -> vector<4x256xf32>
    %cst_148 = arith.constant 1.06140542 : f32
    %258 = vector.broadcast %cst_148 : f32 to vector<4x256xf32>
    %259 = arith.mulf %258, %257 : vector<4x256xf32>
    %cst_149 = arith.constant -1.45315206 : f32
    %260 = vector.broadcast %cst_149 : f32 to vector<4x256xf32>
    %261 = arith.addf %259, %260 : vector<4x256xf32>
    %262 = arith.mulf %261, %257 : vector<4x256xf32>
    %cst_150 = arith.constant 1.42141378 : f32
    %263 = vector.broadcast %cst_150 : f32 to vector<4x256xf32>
    %264 = arith.addf %262, %263 : vector<4x256xf32>
    %265 = arith.mulf %264, %257 : vector<4x256xf32>
    %cst_151 = arith.constant -0.284496725 : f32
    %266 = vector.broadcast %cst_151 : f32 to vector<4x256xf32>
    %267 = arith.addf %265, %266 : vector<4x256xf32>
    %268 = arith.mulf %267, %257 : vector<4x256xf32>
    %cst_152 = arith.constant 0.254829586 : f32
    %269 = vector.broadcast %cst_152 : f32 to vector<4x256xf32>
    %270 = arith.addf %268, %269 : vector<4x256xf32>
    %271 = arith.mulf %270, %257 : vector<4x256xf32>
    %cst_153 = arith.constant 0.000000e+00 : f32
    %272 = vector.broadcast %cst_153 : f32 to vector<4x256xf32>
    %273 = arith.subf %272, %252 : vector<4x256xf32>
    %274 = arith.mulf %273, %252 : vector<4x256xf32>
    %275 = math.exp %274 : vector<4x256xf32>
    %276 = arith.mulf %271, %275 : vector<4x256xf32>
    %cst_154 = arith.constant 1.000000e+00 : f32
    %277 = vector.broadcast %cst_154 : f32 to vector<4x256xf32>
    %278 = arith.subf %277, %276 : vector<4x256xf32>
    %cst_155 = arith.constant 0.000000e+00 : f32
    %279 = vector.broadcast %cst_155 : f32 to vector<4x256xf32>
    %280 = arith.cmpf oge, %251, %279 : vector<4x256xf32>
    %cst_156 = arith.constant 0.000000e+00 : f32
    %281 = vector.broadcast %cst_156 : f32 to vector<4x256xf32>
    %282 = arith.subf %281, %278 : vector<4x256xf32>
    %283 = arith.select %280, %278, %282 : vector<4x256xi1>, vector<4x256xf32>
    %cst_157 = arith.constant 1.000000e+00 : f32
    %284 = vector.broadcast %cst_157 : f32 to vector<4x256xf32>
    %285 = arith.addf %284, %283 : vector<4x256xf32>
    %286 = arith.mulf %249, %285 : vector<4x256xf32>
    %c0_158 = arith.constant 0 : index
    %c17_159 = arith.constant 17 : index
    %287 = vector.load %arg19[%c0_158, %c17_159] : memref<8x290xf32, #tpu.memory_space<vmem>>, vector<4x256xf32>
    tpu.vector_store %arg19[%c0_158, %c17_159], %286 {strides = array<i32>} : memref<8x290xf32, #tpu.memory_space<vmem>>, vector<4x256xf32>,
    %c0_160 = arith.constant 0 : index
    %c0_161 = arith.constant 0 : index
    %288 = vector.load %arg19[%c0_160, %c0_161] : memref<8x290xf32, #tpu.memory_space<vmem>>, vector<4x256xf32>
    %289 = vector.broadcast %4 : vector<1x256xf32> to vector<4x256xf32>
    %290 = arith.mulf %288, %289 : vector<4x256xf32>
    %c0_162 = arith.constant 0 : index
    %c1_163 = arith.constant 1 : index
    %291 = vector.load %arg19[%c0_162, %c1_163] : memref<8x290xf32, #tpu.memory_space<vmem>>, vector<4x256xf32>
    %c0_164 = arith.constant 0 : index
    %c2_165 = arith.constant 2 : index
    %292 = vector.load %arg19[%c0_164, %c2_165] : memref<8x290xf32, #tpu.memory_space<vmem>>, vector<4x256xf32>
    %293 = vector.broadcast %5 : vector<1x256xf32> to vector<4x256xf32>
    %294 = arith.mulf %292, %293 : vector<4x256xf32>
    %c0_166 = arith.constant 0 : index
    %c16_167 = arith.constant 16 : index
    %295 = vector.load %arg19[%c0_166, %c16_167] : memref<8x290xf32, #tpu.memory_space<vmem>>, vector<4x256xf32>
    %296 = vector.broadcast %4 : vector<1x256xf32> to vector<4x256xf32>
    %297 = arith.mulf %295, %296 : vector<4x256xf32>
    %c0_168 = arith.constant 0 : index
    %c17_169 = arith.constant 17 : index
    %298 = vector.load %arg19[%c0_168, %c17_169] : memref<8x290xf32, #tpu.memory_space<vmem>>, vector<4x256xf32>
    %c0_170 = arith.constant 0 : index
    %c18_171 = arith.constant 18 : index
    %299 = vector.load %arg19[%c0_170, %c18_171] : memref<8x290xf32, #tpu.memory_space<vmem>>, vector<4x256xf32>
    %300 = vector.broadcast %5 : vector<1x256xf32> to vector<4x256xf32>
    %301 = arith.mulf %299, %300 : vector<4x256xf32>
    %c0_172 = arith.constant 0 : index
    %c32_173 = arith.constant 32 : index
    %302 = vector.load %arg19[%c0_172, %c32_173] : memref<8x290xf32, #tpu.memory_space<vmem>>, vector<4x256xf32>
    %303 = vector.broadcast %4 : vector<1x256xf32> to vector<4x256xf32>
    %304 = arith.mulf %302, %303 : vector<4x256xf32>
    %c0_174 = arith.constant 0 : index
    %c33_175 = arith.constant 33 : index
    %305 = vector.load %arg19[%c0_174, %c33_175] : memref<8x290xf32, #tpu.memory_space<vmem>>, vector<4x256xf32>
    %c0_176 = arith.constant 0 : index
    %c34_177 = arith.constant 34 : index
    %306 = vector.load %arg19[%c0_176, %c34_177] : memref<8x290xf32, #tpu.memory_space<vmem>>, vector<4x256xf32>
    %307 = vector.broadcast %5 : vector<1x256xf32> to vector<4x256xf32>
    %308 = arith.mulf %306, %307 : vector<4x256xf32>
    %309 = tpu.concatenate %290, %291, %294, %297, %298, %301, %304, %305, %308 in 0 : vector<4x256xf32>, vector<4x256xf32>, vector<4x256xf32>, vector<4x256xf32>, vector<4x256xf32>, vector<4x256xf32>, vector<4x256xf32>, vector<4x256xf32>, vector<4x256xf32> -> vector<36x256xf32>
    %c0_178 = arith.constant 0 : index
    %c0_179 = arith.constant 0 : index
    %310 = vector.load %arg15[%c0_178, %c0_179] : memref<4x36xf32, #tpu.memory_space<vmem>>, vector<4x36xf32>
    %cst_180 = arith.constant dense<0.000000e+00> : vector<4x256xf32>
    %311 = tpu.matmul %310, %309, %cst_180 {dimension_numbers = #tpu.dot_dimension_numbers<[1], [0], [0], [1], [0, 0, 1, 1], [], []>} : vector<4x36xf32>, vector<36x256xf32>, vector<4x256xf32> -> vector<4x256xf32>
    %c0_181 = arith.constant 0 : index
    %c0_182 = arith.constant 0 : index
    %312 = vector.load %arg16[%c0_181, %c0_182] : memref<4x1xf32, #tpu.memory_space<vmem>>, vector<4x1xf32>
    %c0_183 = arith.constant 0 : index
    %c0_184 = arith.constant 0 : index
    %313 = vector.load %arg17[%c0_183, %c0_184] : memref<4x1xf32, #tpu.memory_space<vmem>>, vector<4x1xf32>
    %cst_185 = arith.constant dense<0.000000e+00> : vector<4xf32>
    %314 = vector.multi_reduction <add>, %311, %cst_185 [1] : vector<4x256xf32> to vector<4xf32>
    %315 = vector.shape_cast %314 : vector<4xf32> to vector<4x1xf32>
    %cst_186 = arith.constant dense<0.000000e+00> : vector<1xf32>
    %316 = vector.multi_reduction <add>, %315, %cst_186 [0] : vector<4x1xf32> to vector<1xf32>
    %317 = vector.shape_cast %316 : vector<1xf32> to vector<1x1xf32>
    %cst_187 = arith.constant 1.024000e+03 : f32
    %318 = vector.broadcast %cst_187 : f32 to vector<1x1xf32>
    %319 = arith.divf %317, %318 : vector<1x1xf32>
    %320 = vector.broadcast %319 : vector<1x1xf32> to vector<4x256xf32>
    %321 = arith.subf %311, %320 : vector<4x256xf32>
    %322 = arith.mulf %321, %321 : vector<4x256xf32>
    %cst_188 = arith.constant dense<0.000000e+00> : vector<4xf32>
    %323 = vector.multi_reduction <add>, %322, %cst_188 [1] : vector<4x256xf32> to vector<4xf32>
    %324 = vector.shape_cast %323 : vector<4xf32> to vector<4x1xf32>
    %cst_189 = arith.constant dense<0.000000e+00> : vector<1xf32>
    %325 = vector.multi_reduction <add>, %324, %cst_189 [0] : vector<4x1xf32> to vector<1xf32>
    %326 = vector.shape_cast %325 : vector<1xf32> to vector<1x1xf32>
    %cst_190 = arith.constant 1.024000e+03 : f32
    %327 = vector.broadcast %cst_190 : f32 to vector<1x1xf32>
    %328 = arith.divf %326, %327 : vector<1x1xf32>
    %cst_191 = arith.constant 9.99999974E-6 : f32
    %329 = vector.broadcast %cst_191 : f32 to vector<1x1xf32>
    %330 = arith.addf %328, %329 : vector<1x1xf32>
    %331 = math.rsqrt %330 : vector<1x1xf32>
    %332 = vector.broadcast %331 : vector<1x1xf32> to vector<4x256xf32>
    %333 = arith.mulf %321, %332 : vector<4x256xf32>
    %334 = vector.broadcast %312 : vector<4x1xf32> to vector<4x256xf32>
    %335 = arith.mulf %333, %334 : vector<4x256xf32>
    %336 = vector.broadcast %313 : vector<4x1xf32> to vector<4x256xf32>
    %337 = arith.addf %335, %336 : vector<4x256xf32>
    %c0_192 = arith.constant 0 : index
    %c0_193 = arith.constant 0 : index
    %c0_194 = arith.constant 0 : index
    %338 = vector.load %arg18[%c0_192, %c0_193, %c0_194] : memref<1x4x256xf32, #tpu.memory_space<vmem>>, vector<1x4x256xf32>
    %339 = vector.shape_cast %338 : vector<1x4x256xf32> to vector<4x256xf32>
    %340 = vector.shape_cast %337 : vector<4x256xf32> to vector<1x4x256xf32>
    tpu.vector_store %arg18[%c0_192, %c0_193, %c0_194], %340 {strides = array<i32>} : memref<1x4x256xf32, #tpu.memory_space<vmem>>, vector<1x4x256xf32>,
    return
  }
  func.func @transform_0(%arg0: i32) -> (i32, i32, i32, i32) {
    %c0_i32 = arith.constant 0 : i32
    %c0_i32_0 = arith.constant 0 : i32
    %c0_i32_1 = arith.constant 0 : i32
    %c0_i32_2 = arith.constant 0 : i32
    return %arg0, %c0_i32, %c0_i32_0, %c0_i32_1 : i32, i32, i32, i32
  }
  func.func @transform_1(%arg0: i32) -> (i32, i32, i32) {
    %c0_i32 = arith.constant 0 : i32
    %c0_i32_0 = arith.constant 0 : i32
    %c0_i32_1 = arith.constant 0 : i32
    return %arg0, %c0_i32, %c0_i32_0 : i32, i32, i32
  }
  func.func @transform_2(%arg0: i32) -> (i32, i32, i32) {
    %c0_i32 = arith.constant 0 : i32
    %c0_i32_0 = arith.constant 0 : i32
    %c0_i32_1 = arith.constant 0 : i32
    %c0_i32_2 = arith.constant 0 : i32
    return %c0_i32, %c0_i32_0, %c0_i32_1 : i32, i32, i32
  }
  func.func @transform_3(%arg0: i32) -> (i32, i32, i32) {
    %c0_i32 = arith.constant 0 : i32
    %c0_i32_0 = arith.constant 0 : i32
    %c0_i32_1 = arith.constant 0 : i32
    %c0_i32_2 = arith.constant 0 : i32
    return %c0_i32, %c0_i32_0, %c0_i32_1 : i32, i32, i32
  }
  func.func @transform_4(%arg0: i32) -> (i32, i32) {
    %c0_i32 = arith.constant 0 : i32
    %c0_i32_0 = arith.constant 0 : i32
    %c0_i32_1 = arith.constant 0 : i32
    return %c0_i32, %c0_i32_0 : i32, i32
  }
  func.func @transform_5(%arg0: i32) -> (i32, i32) {
    %c0_i32 = arith.constant 0 : i32
    %c0_i32_0 = arith.constant 0 : i32
    %c0_i32_1 = arith.constant 0 : i32
    return %c0_i32, %c0_i32_0 : i32, i32
  }
  func.func @transform_6(%arg0: i32) -> (i32, i32) {
    %c0_i32 = arith.constant 0 : i32
    %c0_i32_0 = arith.constant 0 : i32
    %c0_i32_1 = arith.constant 0 : i32
    return %c0_i32, %c0_i32_0 : i32, i32
  }
  func.func @transform_7(%arg0: i32) -> (i32, i32) {
    %c0_i32 = arith.constant 0 : i32
    %c0_i32_0 = arith.constant 0 : i32
    %c0_i32_1 = arith.constant 0 : i32
    return %c0_i32, %c0_i32_0 : i32, i32
  }
  func.func @transform_8(%arg0: i32) -> (i32, i32) {
    %c0_i32 = arith.constant 0 : i32
    %c0_i32_0 = arith.constant 0 : i32
    %c0_i32_1 = arith.constant 0 : i32
    return %c0_i32, %c0_i32_0 : i32, i32
  }
  func.func @transform_9(%arg0: i32) -> (i32, i32) {
    %c0_i32 = arith.constant 0 : i32
    %c0_i32_0 = arith.constant 0 : i32
    %c0_i32_1 = arith.constant 0 : i32
    return %c0_i32, %c0_i32_0 : i32, i32
  }
  func.func @transform_10(%arg0: i32) -> (i32, i32) {
    %c0_i32 = arith.constant 0 : i32
    %c0_i32_0 = arith.constant 0 : i32
    %c0_i32_1 = arith.constant 0 : i32
    return %c0_i32, %c0_i32_0 : i32, i32
  }
  func.func @transform_11(%arg0: i32) -> (i32, i32) {
    %c0_i32 = arith.constant 0 : i32
    %c0_i32_0 = arith.constant 0 : i32
    %c0_i32_1 = arith.constant 0 : i32
    return %c0_i32, %c0_i32_0 : i32, i32
  }
  func.func @transform_12(%arg0: i32) -> (i32, i32) {
    %c0_i32 = arith.constant 0 : i32
    %c0_i32_0 = arith.constant 0 : i32
    %c0_i32_1 = arith.constant 0 : i32
    return %c0_i32, %c0_i32_0 : i32, i32
  }
  func.func @transform_13(%arg0: i32) -> (i32, i32) {
    %c0_i32 = arith.constant 0 : i32
    %c0_i32_0 = arith.constant 0 : i32
    %c0_i32_1 = arith.constant 0 : i32
    return %c0_i32, %c0_i32_0 : i32, i32
  }
  func.func @transform_14(%arg0: i32) -> (i32, i32) {
    %c0_i32 = arith.constant 0 : i32
    %c0_i32_0 = arith.constant 0 : i32
    %c0_i32_1 = arith.constant 0 : i32
    return %c0_i32, %c0_i32_0 : i32, i32
  }
  func.func @transform_15(%arg0: i32) -> (i32, i32) {
    %c0_i32 = arith.constant 0 : i32
    %c0_i32_0 = arith.constant 0 : i32
    %c0_i32_1 = arith.constant 0 : i32
    return %c0_i32, %c0_i32_0 : i32, i32
  }
  func.func @transform_16(%arg0: i32) -> (i32, i32) {
    %c0_i32 = arith.constant 0 : i32
    %c0_i32_0 = arith.constant 0 : i32
    %c0_i32_1 = arith.constant 0 : i32
    return %c0_i32, %c0_i32_0 : i32, i32
  }
  func.func @transform_17(%arg0: i32) -> (i32, i32, i32) {
    %c0_i32 = arith.constant 0 : i32
    %c0_i32_0 = arith.constant 0 : i32
    %c0_i32_1 = arith.constant 0 : i32
    return %arg0, %c0_i32, %c0_i32_0 : i32, i32, i32
  }
}

</mosaic_0001>

<bundles_post_ra>
// kernel: tpu_custom_call.1
= control target key start
LH: loop header
LB: loop body
LE: loop exit
PB: predicated region body
PF: predicated region fallthrough
CT: control target
= control target key end

     0   :  { %s3938_s0 = inlined_call_operand.vmem [shape: f32[2,4,8,8], index: 0, kind: input, shape index: {}]   ;;  %s3939_s1 = inlined_call_operand.vmem [shape: f32[2,4,256], index: 1, kind: input, shape index: {}]   ;;  %s3940_s2 = inlined_call_operand.vmem [shape: f32[4,8,16], index: 2, kind: input, shape index: {}]   ;;  %s3941_s3 = inlined_call_operand.vmem [shape: f32[4,16,8], index: 3, kind: input, shape index: {}]   ;;  %s3942_s4 = inlined_call_operand.vmem [shape: f32[2,256], index: 4, kind: input, shape index: {}]   ;;  %s3943_s5 = inlined_call_operand.vmem [shape: f32[8,72], index: 5, kind: input, shape index: {}]   ;;  %s3944_s6 = inlined_call_operand.vmem [shape: f32[8,1], index: 6, kind: input, shape index: {}]   ;;  %s3945_s7 = inlined_call_operand.vmem [shape: f32[8,1], index: 7, kind: input, shape index: {}]   ;;  %s3946_s8 = inlined_call_operand.vmem [shape: f32[8,72], index: 8, kind: input, shape index: {}]   ;;  %s3947_s9 = inlined_call_operand.vmem [shape: f32[8,1], index: 9, kind: input, shape index: {}]   ;;  %s3948_s10 = inlined_call_operand.vmem [shape: f32[8,1], index: 10, kind: input, shape index: {}]   ;;  %s3949_s11 = inlined_call_operand.vmem [shape: f32[4,72], index: 11, kind: input, shape index: {}]   ;;  %s3950_s12 = inlined_call_operand.vmem [shape: f32[4,1], index: 12, kind: input, shape index: {}]   ;;  %s3951_s13 = inlined_call_operand.vmem [shape: f32[4,1], index: 13, kind: input, shape index: {}]   ;;  %s3952_s14 = inlined_call_operand.vmem [shape: f32[4,36], index: 14, kind: input, shape index: {}]   ;;  %s3953_s15 = inlined_call_operand.vmem [shape: f32[4,1], index: 15, kind: input, shape index: {}]   ;;  %s3954_s16 = inlined_call_operand.vmem [shape: f32[4,1], index: 16, kind: input, shape index: {}]   ;;  %s3955_s17 = inlined_call_operand.hbm [shape: f32[2,4,256], index: 17, kind: output, shape index: {}]  }
   0x1   :  { %3977 = sst [smem:[#allocation9_spill]] %s3938_s0 }
   0x2   :  { %3978 = sst [smem:[#allocation10_spill]] %s3939_s1 }
   0x3   :  { %3979 = sst [smem:[#allocation11_spill]] %s3940_s2 }
   0x4   :  { %3980 = sst [smem:[#allocation12_spill]] %s3941_s3 }
   0x5   :  { %3981 = sst [smem:[#allocation13_spill]] %s3942_s4 }
   0x6   :  { %3982 = sst [smem:[#allocation14_spill]] %s3943_s5 }
   0x7   :  { %22 = vsyncpa [#allocation4], 0 }
   0x8   :  { %24 = vsyncpa [#allocation4 + $0x1], 0  ;;  %s3354_s24 = smov 0   ;;  %s3356_s25 = smov 0  }
   0x9   :  { %s3358_s26 = smov 0   ;;  %s3360_s27 = smov 0  }
   0xa LB: > { %3983 = sst [smem:[#allocation6_spill]] %s3235_s26  ;;  %s3375_s28 = sadd.s32 4294967295, %s3239_s27   ;;  %s3239_s27 = sphi %s3360_s27, %s4003_s27   ;;  %s3235_s26 = sphi %s3358_s26, %s4005_s26   ;;  %s3231_s25 = sphi %s3356_s25, %s4007_s25   ;;  %s3227_s24 = sphi %s3354_s24, %s4006_s24  }
   0xb   : > { %s2789_s29 = sadd.s32 4294967294, %s3239_s27   ;;  %s3379_s0 = sadd.s32 1, %s3239_s27  }
   0xc   : > { %3984 = sst [smem:[#allocation7_spill]] %s3379_s0  ;;  %s404_s30 = sadd.s32 1, %s3235_s26 }
   0xd   : > { %s401_s18 = ssub.s32 %s3239_s27, %s3379_s0  ;;  %p414_p0 = scmp.ne.s32.totalorder %s3235_s26, %s3231_s25 }
   0xe   : > { %p402_p1 = scmp.eq.s32.totalorder %s401_s18, 0  ;;  %p415_p2 = scmp.eq.s32.totalorder %s3375_s28, 1 }
   0xf   : > { %p420_p3 = scmp.ne.s32.totalorder %s3231_s25, %s3227_s24  ;;  %p421_p4 = scmp.eq.s32.totalorder %s2789_s29, 1 }
  0x10   : > { %s3390_s19 = scalar_select %p402_p1, %s3235_s26, %s404_s30  }
  0x11   : > { %p3392_p5 = por %p415_p2, %p414_p0  ;;  %p3396_p6 = por %p421_p4, %p420_p3 }
  0x12   : > { %3985 = sst [smem:[#allocation8_spill]] %s3390_s19  ;;  %p2792_p7 = scmp.ge.s32.totalorder %s3239_s27, 1 }
  0x13   : > { %p500_p8 = scmp.lt.s32.totalorder %s3239_s27, 3 }
  0x15   : > { %p501_p9 = pnand %p2792_p7, %p500_p8 }
  0x16   : > { %s3988_s2 = sld [smem:[#allocation11_spill]] (!%p501_p9)  ;;  %p557_p10 = scmp.lt.s32.totalorder (!%p501_p9), %s3375_s28, 1  ;;  %v3241_v1 = vmov (!%p501_p9), 0.0   ;;  %vm3242_vm0 = vmmov (!%p501_p9), 0   ;;  %vm582_vm1 = vcmask (!%p501_p9), 64512   ;;  %v1212_v27 = vlaneseq (!%p501_p9) }
  0x17   : > { %504 = sbr.rel (%p501_p9) target bundleno = 4100 (0x1004), region = 88  ;;  %2845 = vmatprep.subr.mxu1 (!%p501_p9), %v3241_v1  ;;  %2847 = vmatprep.mubr.msk.f32.mxu1 (!%p501_p9), %vm3242_vm0, %v3241_v1  ;;  %s3989_s19 = sld [smem:[#allocation9_spill]] (!%p501_p9)  ;;  %v3243_v25 = vmov (!%p501_p9), 1983009808   ;;  %v3244_v30 = vmov (!%p501_p9), 1934713408  }
  0x18   : > { %2855 = vmatprep.subr.mxu0 (!%p501_p9), %v3241_v1  ;;  %2857 = vmatprep.mubr.msk.f32.mxu0 (!%p501_p9), %vm3242_vm0, %v3241_v1  ;;  %s3990_s3 = sld [smem:[#allocation12_spill]] (!%p501_p9)  ;;  %v1210_v26 = vunpack.c.l.s4 (!%p501_p9), %v3243_v25  ;;  %v1242_v31 = vunpack.c.l.s4 (!%p501_p9), %v3244_v30  ;;  %v3472_v33 = vshrl.u32 (!%p501_p9), %v1212_v27, 7  ;;  %s3959_s22 = smov (!%p501_p9), 96   ;;  %vm567_vm2 = vcmask (!%p501_p9), 138240  }
  0x19   : > { %s3248_s23 = smov (!%p501_p9), 16   ;;  %s3249_s0 = smov (!%p501_p9), 48   ;;  %vm569_vm3 = vcmask (!%p501_p9), 277640   ;;  %568 = vst.msk [vmem:[#allocation2] sm:$0xff] (!%p501_p9), %vm567_vm2, %v3241_v1  ;;  %vm1399_vm4 = vcmask (!%p501_p9), 130048   ;;  %vm1401_vm5 = vcmask (!%p501_p9), 261120  }
  0x1a   : > { %v1211_v32 = vunpack.c.0.s8 (!%p501_p9), %v1210_v26  ;;  %v1243_v42 = vunpack.c.0.s8 (!%p501_p9), %v1242_v31  ;;  %s3250_s29 = smov (!%p501_p9), 80   ;;  %570 = vst.msk [vmem:[#allocation2 + $0x10] sm:$0xff] (!%p501_p9), %vm569_vm3, %v3241_v1  ;;  %vm1403_vm6 = vcmask (!%p501_p9), 392192   ;;  %vm1405_vm7 = vcmask (!%p501_p9), 523264   ;;  %s3992_s4 = sld [smem:[#allocation13_spill]] (!%p501_p9) }
  0x1b   : > { %vm1407_vm8 = vcmask (!%p501_p9), 654336   ;;  %vm1409_vm9 = vcmask (!%p501_p9), 785408   ;;  %vm1411_vm10 = vcmask (!%p501_p9), 916480   ;;  %vm1430_vm11 = vcmask (!%p501_p9), 1043456   ;;  %s3994_s5 = sld [smem:[#allocation14_spill]] (!%p501_p9) }
  0x1c   : > { %v578_v0 = vld [vmem:[%s3988_s2] sm:$0xff] (!%p501_p9)  ;;  %v580_v2 = vld [vmem:[%s3988_s2 + $0x10] sm:$0xff] (!%p501_p9)  ;;  %v579_v3 = vld [vmem:[%s3988_s2 + $0x8] sm:$0xff] (!%p501_p9)  ;;  %v1214_v43 = vsub.s32 (!%p501_p9), %v1211_v32, %v3472_v33  ;;  %v1246_v50 = vsub.s32 (!%p501_p9), %v1243_v42, %v3472_v33  ;;  %vm1443_vm12 = vcmask (!%p501_p9), 1047688   ;;  %vm1499_vm13 = vcmask (!%p501_p9), 146432  }
  0x1d   : > { %2846 = vmatpush3.msra.mxu1 (!%p501_p9), %v578_v0  ;;  %2856 = vmatpush3.msra.mxu0 (!%p501_p9), %v580_v2  ;;  %v581_v7 = vld [vmem:[%s3988_s2 + $0x18] sm:$0xff] (!%p501_p9)  ;;  %vm1476_vm14 = vcmask (!%p501_p9), 15360   ;;  %vm1522_vm15 = vcmask (!%p501_p9), 277504   ;;  %vm1553_vm3 = vcmask (!%p501_p9), 1031168  }
  0x1e   : > { %s3413_s30 = scalar_select %p557_p10, %s3375_s28, 1  ;;  %2850 = vmatprep.subr.mxu1 %v3241_v1  ;;  %v875_v9 = vld [vmem:[%s3990_s3] sm:$0xff]  ;;  %v877_v10 = vld [vmem:[%s3990_s3 + $0x10] sm:$0xff]  ;;  %v876_v12 = vld [vmem:[%s3990_s3 + $0x8] sm:$0xff] }
  0x1f   : > { %v879_v16 = vld [vmem:[%s3990_s3 + $0x20] sm:$0xff]  ;;  %v878_v18 = vld [vmem:[%s3990_s3 + $0x18] sm:$0xff]  ;;  %v880_v19 = vld [vmem:[%s3990_s3 + $0x28] sm:$0xff] }
  0x20   : > { %s2822_s18 = sshll.u32 %s3413_s30, 5  ;;  %v881_v21 = vld [vmem:[%s3990_s3 + $0x30] sm:$0xff]  ;;  %v882_v23 = vld [vmem:[%s3990_s3 + $0x38] sm:$0xff]  ;;  %s2823_s21 = sshll.u32 %s3413_s30, 3 }
  0x21   : > { %s561_s26 = scalar_lea.vmem %s3989_s19, %s2822_s18  ;;  %s3245_s19 = smov 32  }
  0x22   : > { %v574_v4 = vld [vmem:[%s561_s26] sm:$0xff]  ;;  %v576_v5 = vld [vmem:[%s561_s26 + $0x10] sm:$0xff]  ;;  %v575_v6 = vld [vmem:[%s561_s26 + $0x8] sm:$0xff]  ;;  %s3246_s18 = smov 64   ;;  %s3254_s30 = smov 18  }
  0x23   : > { %2848 = vmatmul.mubr.msk.f32.vlgmr.msra.gmra.mrb[0].mxu1 %vm582_vm1, %v574_v4  ;;  %2858 = vmatmul.mubr.msk.f32.vlgmr.msra.gmra.mrb[0].mxu0 %vm582_vm1, %v576_v5  ;;  %v577_v8 = vld [vmem:[%s561_s26 + $0x18] sm:$0xff]  ;;  %s3969_s26 = smov 112  }
  0x24   : > { %2851 = vmatpush3.msra.mxu1 %v579_v3  ;;  %2852 = vmatprep.mubr.msk.f32.mxu1 %vm3242_vm0, %v3241_v1 }
  0x25   : > { %2860 = vmatprep.subr.mxu1 %v3241_v1  ;;  %2867 = vmatprep.mubr.msk.f32.mxu0 %vm582_vm1, %v875_v9 }
  0x27   : > { %2853 = vmatmul.mubr.msk.f32.vlgmr.msra.gmra.mrb[2].mxu1 %vm582_vm1, %v575_v6 }
  0x28   : > { %2861 = vmatpush3.msra.mxu1 %v581_v7  ;;  %2862 = vmatprep.mubr.msk.f32.mxu1 %vm3242_vm0, %v3241_v1  ;;  %vm1539_vm0 = vcmask 1039360  }
  0x2b   : > { %2863 = vmatmul.mubr.msk.f32.vlgmr.msra.gmra.mrb[4].mxu1 %vm582_vm1, %v577_v8 }
  0x2c   : > { %2872 = vmatprep.mubr.msk.f32.mxu1 %vm582_vm1, %v877_v10 }
  0xf6   : > { %v652_v11 = vpop.f32.mrb[0].mxu1  ;;  %v798_v13 = vpop.f32.mrb[0].mxu0 }
  0xf7   : > { %v2849_v14 = vpop.f32.mrb[1].mxu1  ;;  %2865 = vmatprep.subr.mxu0 %v652_v11  ;;  %v2859_v15 = vpop.f32.mrb[1].mxu0 }
  0xf8   : > { %2866 = vmatpush3.msra.mxu0 %v652_v11 }
  0xf9   : > { %2868 = vmatmul.mubr.msk.f32.vlgmr.msra.gmra.mrb[2].mxu0 %vm582_vm1, %v876_v12  ;;  %2875 = vmatprep.subr.mxu0 %v798_v13 }
  0xfa   : > { %v725_v17 = vpop.f32.mrb[2].mxu1  ;;  %2876 = vmatpush3.msra.mxu0 %v798_v13  ;;  %2877 = vmatprep.mubr.msk.f32.mxu0 %vm582_vm1, %v879_v16 }
  0xfb   : > { %v2854_v20 = vpop.f32.mrb[3].mxu1  ;;  %2870 = vmatprep.subr.mxu1 %v725_v17 }
  0xfc   : > { %2871 = vmatpush3.msra.mxu1 %v725_v17 }
  0xfd   : > { %2873 = vmatmul.mubr.msk.f32.vlgmr.msra.gmra.mrb[6].mxu1 %vm582_vm1, %v878_v18  ;;  %2878 = vmatmul.mubr.msk.f32.vlgmr.msra.gmra.mrb[4].mxu0 %vm582_vm1, %v880_v19 }
  0xfe   : > { %v871_v22 = vpop.f32.mrb[4].mxu1  ;;  %2882 = vmatprep.mubr.msk.f32.mxu1 %vm582_vm1, %v881_v21  ;;  %1703 = vmatprep.mubr.f32.mxu0 %v3241_v1 }
  0xff   : > { %v2864_v24 = vpop.f32.mrb[5].mxu1  ;;  %2880 = vmatprep.subr.mxu1 %v871_v22 }
 0x100   : > { %2881 = vmatpush3.msra.mxu1 %v871_v22 }
 0x101   : > { %2883 = vmatmul.mubr.msk.f32.vlgmr.msra.gmra.mrb[8].mxu1 %vm582_vm1, %v882_v23  ;;  %vm1591_vm1 = vcmask 900096  }
 0x102   : > { %2006 = vmatprep.mubr.f32.mxu1 %v3241_v1 }
 0x1cc   : > { %v2869_v28 = vpop.f32.mrb[2].mxu0 }
 0x1cd   : > { %v955_v29 = vpop.f32.mrb[3].mxu0 }
 0x1d0   : > { %v2874_v34 = vpop.f32.mrb[6].mxu1  ;;  %v2879_v35 = vpop.f32.mrb[4].mxu0 }
 0x1d1   : > { %v1275_v36 = vcombine.low %v2869_v28, %v2879_v35  ;;  %v1276_v37 = vcombine.high %v2869_v28, %v2879_v35  ;;  %v1036_v38 = vpop.f32.mrb[7].mxu1  ;;  %v1117_v39 = vpop.f32.mrb[5].mxu0 }
 0x1d2   : > { %v1207_v40 = vcombine.low %v955_v29, %v1117_v39  ;;  %v1208_v41 = vcombine.high %v955_v29, %v1117_v39 }
 0x1d3   : > { %v1283_v51 = vrot.slane %v1275_v36, %v1214_v43  ;;  %v1290_v52 = vrot.slane %v1276_v37, %v1214_v43 }
 0x1d4   : > { %v2884_v44 = vpop.f32.mrb[8].mxu1  ;;  %v1215_v55 = vrot.slane %v1207_v40, %v1214_v43  ;;  %v1222_v56 = vrot.slane %v1208_v41, %v1214_v43 }
 0x1d5   : > { %v1291_v45 = vcombine.low %v2874_v34, %v2884_v44  ;;  %v1292_v46 = vcombine.high %v2874_v34, %v2884_v44  ;;  %v1198_v47 = vpop.f32.mrb[9].mxu1 }
 0x1d6   : > { %v1223_v48 = vcombine.low %v1036_v38, %v1198_v47  ;;  %v1224_v49 = vcombine.high %v1036_v38, %v1198_v47 }
 0x1d7   : > { %v1299_v53 = vrot.slane %v1291_v45, %v1214_v43  ;;  %v1306_v54 = vrot.slane %v1292_v46, %v1214_v43 }
 0x1d8   : > { %v1231_v57 = vrot.slane %v1223_v48, %v1214_v43  ;;  %v1238_v58 = vrot.slane %v1224_v49, %v1214_v43 }
 0x1d9   : > { %v1307_v59 = vcombine.low %v1283_v51, %v1299_v53  ;;  %v1323_v60 = vcombine.low %v1290_v52, %v1306_v54  ;;  %v1324_v61 = vcombine.high %v1290_v52, %v1306_v54  ;;  %v1308_v62 = vcombine.high %v1283_v51, %v1299_v53  ;;  %v2798_v53 = vld [vmem:[%s3992_s4 + $0x1] ss:$2 sm:$0x3] }
 0x1da   : > { %v1239_v63 = vcombine.low %v1215_v55, %v1231_v57  ;;  %v1240_v0 = vcombine.high %v1215_v55, %v1231_v57  ;;  %v1256_v2 = vcombine.high %v1222_v56, %v1238_v58  ;;  %v1255_v3 = vcombine.low %v1222_v56, %v1238_v58 }
 0x1db   : > { %v1322_v4 = vrot.slane %v1308_v62, %v1246_v50  ;;  %v1331_v6 = vrot.slane %v1323_v60, %v1246_v50  ;;  %v1315_v8 = vrot.slane %v1307_v59, %v1246_v50  ;;  %v1338_v9 = vrot.slane %v1324_v61, %v1246_v50  ;;  %v571_v59 = vld [vmem:[%s3992_s4] ss:$2 sm:$0x3] }
 0x1dc   : > { %v1263_v5 = vrot.slane %v1255_v3, %v1246_v50  ;;  %v1270_v7 = vrot.slane %v1256_v2, %v1246_v50  ;;  %v1247_v11 = vrot.slane %v1239_v63, %v1246_v50  ;;  %v1254_v12 = vrot.slane %v1240_v0, %v1246_v50 }
 0x1dd   : > { %1376 = vrot.lane.b32.xlu1 %v1322_v4, %s3245_s19  ;;  %v1339_v10 = vcombine.high %v1315_v8, %v3241_v1  ;;  %v1340_v14 = vcombine.high %v1322_v4, %v3241_v1  ;;  %v1341_v16 = vcombine.high %v1331_v6, %v3241_v1  ;;  %v1342_v18 = vcombine.high %v1338_v9, %v3241_v1 }
 0x1de   : > { %1356 = vrot.lane.b32.xlu0 %v1263_v5, %s3246_s18  ;;  %v1271_v13 = vcombine.high %v1247_v11, %v3241_v1  ;;  %v1272_v15 = vcombine.high %v1254_v12, %v3241_v1  ;;  %v1273_v17 = vcombine.high %v1263_v5, %v3241_v1  ;;  %v1274_v19 = vcombine.high %v1270_v7, %v3241_v1 }
 0x1df   : > { %v1456_v50 = vsub.s32 1, %v3472_v33  ;;  %v1452_v54 = vsub.s32 0, %v3472_v33 }
 0x1e1   : > { %1384 = vrot.lane.b32.xlu1 %v1331_v6, %s3246_s18  ;;  %v1471_v58 = vrot.slane %v2798_v53, %v1456_v50  ;;  %v1467_v33 = vrot.slane %v2798_v53, %v1452_v54  ;;  %v3525_v60 = vrot.slane %v571_v59, %v1456_v50  ;;  %v3527_v61 = vrot.slane %v571_v59, %v1452_v54  ;;  %s3967_s18 = smov 110  }
 0x1e2   : > { %1364 = vrot.lane.b32.xlu0 %v1270_v7, %s3959_s22 }
 0x1e5   : > { %1392 = vrot.lane.b32.xlu1 %v1338_v9, %s3959_s22 }
 0x1e6   : > { %1372 = vrot.lane.b32.xlu0 %v1339_v10, %s3248_s23 }
 0x1e9   : > { %1348 = vrot.lane.b32.xlu1 %v1254_v12, %s3245_s19 }
 0x1ea   : > { %1344 = vrot.lane.b32.xlu0 %v1271_v13, %s3248_s23 }
 0x1ed   : > { %1380 = vrot.lane.b32.xlu1 %v1340_v14, %s3249_s0 }
 0x1ee   : > { %1352 = vrot.lane.b32.xlu0 %v1272_v15, %s3249_s0  ;;  %s3963_s0 = smov 126  }
 0x1f1   : > { %1388 = vrot.lane.b32.xlu1 %v1341_v16, %s3250_s29 }
 0x1f2   : > { %1360 = vrot.lane.b32.xlu0 %v1273_v17, %s3250_s29  ;;  %s3991_s29 = sld [smem:[#allocation10_spill]] }
 0x1f5   : > { %1396 = vrot.lane.b32.xlu1 %v1342_v18, %s3969_s26 }
 0x1f6   : > { %1368 = vrot.lane.b32.xlu0 %v1274_v19, %s3969_s26 }
 0x1f8   : > { %s566_s22 = scalar_lea.vmem %s3991_s29, %s2823_s21  ;;  %s3253_s29 = smov 2  }
 0x1f9   : > { %v1420_v42 = vld [vmem:[%s566_s22] sm:$0xff]  ;;  %s3975_s22 = smov 17   ;;  %s3255_s21 = smov 34  }
 0x1fa   : > { %v1422_v46 = vcombine.high %v1420_v42, %v1420_v42 }
 0x24f   : > { %v1377_v20 = vpop.permute.xlu1 %1376 }
 0x250   : > { %v1357_v21 = vpop.permute.xlu0 %1356 }
 0x253   : > { %v1385_v22 = vpop.permute.xlu1 %1384 }
 0x254   : > { %v1365_v23 = vpop.permute.xlu0 %1364 }
 0x257   : > { %v1393_v24 = vpop.permute.xlu1 %1392 }
 0x258   : > { %v1373_v25 = vpop.permute.xlu0 %1372 }
 0x259   : > { %v1413_v27 = vsel %vm1399_vm4, %v1315_v8, %v1373_v25 }
 0x25a   : > { %v1414_v30 = vsel %vm1401_vm5, %v1413_v27, %v1377_v20 }
 0x25b   : > { %v1349_v26 = vpop.permute.xlu1 %1348 }
 0x25c   : > { %v1345_v28 = vpop.permute.xlu0 %1344 }
 0x25d   : > { %v1400_v29 = vsel %vm1399_vm4, %v1247_v11, %v1345_v28 }
 0x25e   : > { %v1402_v34 = vsel %vm1401_vm5, %v1400_v29, %v1349_v26 }
 0x25f   : > { %v1381_v31 = vpop.permute.xlu1 %1380 }
 0x260   : > { %v1415_v32 = vsel %vm1403_vm6, %v1414_v30, %v1381_v31  ;;  %v1353_v35 = vpop.permute.xlu0 %1352 }
 0x261   : > { %v1404_v36 = vsel %vm1403_vm6, %v1402_v34, %v1353_v35  ;;  %v1416_v37 = vsel %vm1405_vm7, %v1415_v32, %v1385_v22  ;;  %vm1629_vm6 = vcmask 769024  }
 0x262   : > { %v1406_v40 = vsel %vm1405_vm7, %v1404_v36, %v1357_v21  ;;  %vm1635_vm7 = vcmask 588800  }
 0x263   : > { %v1389_v38 = vpop.permute.xlu1 %1388 }
 0x264   : > { %v1417_v39 = vsel %vm1407_vm8, %v1416_v37, %v1389_v38  ;;  %v1361_v41 = vpop.permute.xlu0 %1360 }
 0x265   : > { %v1408_v43 = vsel %vm1407_vm8, %v1406_v40, %v1361_v41  ;;  %v1418_v44 = vsel %vm1409_vm9, %v1417_v39, %v1393_v24 }
 0x266   : > { %v1410_v48 = vsel %vm1409_vm9, %v1408_v43, %v1365_v23 }
 0x267   : > { %v1397_v45 = vpop.permute.xlu1 %1396 }
 0x268   : > { %v1419_v47 = vsel %vm1411_vm10, %v1418_v44, %v1397_v45  ;;  %v1369_v49 = vpop.permute.xlu0 %1368 }
 0x269   : > { %v1427_v51 = vrot.slane %v1419_v47, 4  ;;  %v1412_v52 = vsel %vm1411_vm10, %v1410_v48, %v1369_v49 }
 0x26a   : > { %v1426_v55 = vrot.slane %v1412_v52, 4 }
 0x26b   : > { %v3513_v56 = vsel %vm1430_vm11, %v1422_v46, %v1427_v51 }
 0x26c   : > { %1437 = vrot.lane.b32.xlu1 %v3513_v56, %s3975_s22  ;;  %v3518_v57 = vsel %vm1430_vm11, %v1420_v42, %v1426_v55 }
 0x26d   : > { %1435 = vrot.lane.b32.xlu0 %v3518_v57, %s3975_s22 }
 0x270   : > { %1474 = vrot.lane.b32.xlu1 %v1471_v58, %s3253_s29 }
 0x271   : > { %1472 = vrot.lane.b32.xlu0 %v1467_v33, %s3253_s29  ;;  %s3965_s29 = smov 95  }
 0x274   : > { %1486 = vrot.lane.b32.xlu1 %v3525_v60, %s3248_s23 }
 0x275   : > { %1484 = vrot.lane.b32.xlu0 %v3527_v61, %s3248_s23  ;;  %s3971_s23 = smov 127  }
 0x278   : > { %1497 = vrot.lane.b32.xlu1 %v1471_v58, %s3254_s30 }
 0x279   : > { %1495 = vrot.lane.b32.xlu0 %v1467_v33, %s3254_s30  ;;  %s3993_s30 = smov 96  }
 0x27c   : > { %1509 = vrot.lane.b32.xlu1 %v3525_v60, %s3245_s19 }
 0x27d   : > { %1507 = vrot.lane.b32.xlu0 %v3527_v61, %s3245_s19  ;;  %s3973_s19 = smov 111  }
 0x280   : > { %1520 = vrot.lane.b32.xlu1 %v1471_v58, %s3255_s21 }
 0x281   : > { %1518 = vrot.lane.b32.xlu0 %v1467_v33, %s3255_s21  ;;  %s3961_s21 = smov 94  }
 0x2de   : > { %v1438_v62 = vpop.permute.xlu1 %1437 }
 0x2df   : > { %1446 = vst.msk [vmem:[#allocation2 + $0x10] sm:$0xff] %vm567_vm2, %v1438_v62  ;;  %v1436_v63 = vpop.permute.xlu0 %1435 }
 0x2e0   : > { %1444 = vst.msk [vmem:[#allocation2] sm:$0xff] %vm1443_vm12, %v1436_v63  ;;  %v1439_v7 = vsel %vm567_vm2, %v1436_v63, %v1438_v62 }
 0x2e1   : > { %v1461_v47 = vmul.f32 %v3525_v60, %v1439_v7 }
 0x2e2   : > { %v3539_v0 = vpop.permute.xlu1 %1474 }
 0x2e3   : > { %v3541_v2 = vpop.permute.xlu0 %1472 }
 0x2e4   : > { %v3579_v17 = vsel %vm1476_vm14, %v3541_v2, %v3539_v0 }
 0x2e5   : > { %v1482_v24 = vmul.f32 %v3579_v17, %v1439_v7 }
 0x2e6   : > { %v3543_v3 = vpop.permute.xlu1 %1486  ;;  %v1462_v6 = vld [vmem:[#allocation2 + $0x10] sm:$0xff] }
 0x2e7   : > { %v3545_v4 = vpop.permute.xlu0 %1484  ;;  %v3547_v5 = vld [vmem:[#allocation2] sm:$0xff]  ;;  %v3002_v8 = vpack.i.bf16 %v1462_v6, %v1439_v7  ;;  %v1494_v16 = vmul.f32 %v3543_v3, %v1462_v6  ;;  %v1483_v20 = vmul.f32 %v3539_v0, %v1462_v6 }
 0x2e8   : > { %1571 = vrot.lane.b32.xlu0 %v3547_v5, %s3973_s19  ;;  %1533 = vrot.lane.b32.xlu1 %v3547_v5, %s3971_s23  ;;  %v1492_v9 = vmul.f32 %v3545_v4, %v3547_v5  ;;  %v3559_v10 = vsel %vm1399_vm4, %v3545_v4, %v3543_v3  ;;  %v1481_v18 = vmul.f32 %v3541_v2, %v3547_v5  ;;  %vm1577_vm4 = vcmask 908288  }
 0x2e9   : > { %v1493_v14 = vmul.f32 %v3559_v10, %v1439_v7  ;;  %v3012_v26 = vpack.i.bf16 %v1483_v20, %v1482_v24  ;;  %v1460_v46 = vmul.f32 %v3527_v61, %v3547_v5 }
 0x2ea   : > { %v3563_v12 = vpop.permute.xlu1 %1497 }
 0x2eb   : > { %v3561_v11 = vpop.permute.xlu0 %1495  ;;  %v3017_v19 = vpack.i.bf16 %v1494_v16, %v1493_v14  ;;  %v1506_v25 = vmul.f32 %v3563_v12, %v1462_v6 }
 0x2ec   : > { %3003 = vrot.lane.b32.xlu0 %v3002_v8, %s3971_s23  ;;  %1561 = vrot.lane.b32.xlu1 %v1492_v9, %s3969_s26  ;;  %v1504_v13 = vmul.f32 %v3561_v11, %v3547_v5  ;;  %v3572_v15 = vsel %vm1499_vm13, %v3561_v11, %v3563_v12 }
 0x2ed   : > { %v1505_v21 = vmul.f32 %v3572_v15, %v1439_v7 }
 0x2ee   : > { %v3585_v22 = vpop.permute.xlu1 %1509 }
 0x2ef   : > { %v3587_v23 = vpop.permute.xlu0 %1507  ;;  %v3022_v27 = vpack.i.bf16 %v1506_v25, %v1505_v21  ;;  %v1517_v34 = vmul.f32 %v3585_v22, %v1462_v6 }
 0x2f0   : > { %3008 = vrot.lane.b32.xlu0 %v3002_v8, %s3973_s19  ;;  %1585 = vrot.lane.b32.xlu1 %v1504_v13, %s3967_s18  ;;  %v3596_v28 = vsel %vm1401_vm5, %v3587_v23, %v3585_v22  ;;  %v1515_v29 = vmul.f32 %v3587_v23, %v3547_v5  ;;  %vm1615_vm5 = vcmask 777216  }
 0x2f1   : > { %v1516_v30 = vmul.f32 %v3596_v28, %v1439_v7 }
 0x2f2   : > { %v3603_v31 = vpop.permute.xlu1 %1520 }
 0x2f3   : > { %v3605_v32 = vpop.permute.xlu0 %1518  ;;  %v3032_v35 = vpack.i.bf16 %v1517_v34, %v1516_v30  ;;  %v1529_v37 = vmul.f32 %v3603_v31, %v1462_v6 }
 0x2f4   : > { %1547 = vrot.lane.b32.xlu0 %v1481_v18, %s3963_s0  ;;  %3018 = vrot.lane.b32.xlu1 %v3017_v19, %s3969_s26  ;;  %v3612_v36 = vsel %vm1522_vm15, %v3605_v32, %v3603_v31  ;;  %v1527_v39 = vmul.f32 %v3605_v32, %v3547_v5 }
 0x2f5   : > { %v1528_v38 = vmul.f32 %v3612_v36, %v1439_v7 }
 0x2f8   : > { %3013 = vrot.lane.b32.xlu0 %v3012_v26, %s3963_s0  ;;  %3023 = vrot.lane.b32.xlu1 %v3022_v27, %s3967_s18  ;;  %s3995_s18 = smov 110   ;;  %s3997_s0 = smov 126  }
 0x2fc   : > { %3028 = vrot.lane.b32.xlu1 %v3002_v8, %s3965_s29  ;;  %1599 = vrot.lane.b32.xlu0 %v1515_v29, %s3993_s30 }
 0x300   : > { %1609 = vrot.lane.b32.xlu1 %v3547_v5, %s3965_s29  ;;  %3033 = vrot.lane.b32.xlu0 %v3032_v35, %s3993_s30  ;;  %s3996_s29 = smov 95  }
 0x304   : > { %1627 = vrot.lane.b32.xlu1 %v1529_v37, %s3961_s21  ;;  %1625 = vrot.lane.b32.xlu0 %v1528_v38, %s3961_s21 }
 0x308   : > { %1623 = vrot.lane.b32.xlu0 %v1527_v39, %s3961_s21  ;;  %s3998_s21 = smov 94  }
 0x35a   : > { %v1534_v40 = vpop.permute.xlu1 %1533  ;;  %v1572_v41 = vpop.permute.xlu0 %1571 }
 0x35e   : > { %v1562_v42 = vpop.permute.xlu1 %1561  ;;  %v3004_v43 = vpop.permute.xlu0 %3003 }
 0x35f   : > { %v3006_v44 = vunpack.i.h.bf16 %v3004_v43  ;;  %v3005_v45 = vunpack.i.l.bf16 %v3004_v43 }
 0x361   : > { %v1540_v48 = vsel %vm1539_vm0, %v1534_v40, %v3005_v45  ;;  %v1541_v49 = vsel %vm1539_vm0, %v3005_v45, %v3006_v44 }
 0x362   : > { %v2887_v50 = vpack.c.bf16 %v1540_v48, %v1460_v46  ;;  %v1586_v51 = vpop.permute.xlu1 %1585  ;;  %v3009_v52 = vpop.permute.xlu0 %3008  ;;  %v2885_v53 = vpack.c.bf16 %v1541_v49, %v1461_v47 }
 0x363   : > { %v3011_v33 = vunpack.i.h.bf16 %v3009_v52  ;;  %v3010_v62 = vunpack.i.l.bf16 %v3009_v52 }
 0x364   : > { %2886 = vmatprep.subr.bf16.mxu0 %v2885_v53  ;;  %v1634_v53 = vld [vmem:[%s3994_s5] sm:$0xff] }
 0x365   : > { %2888 = vmatpush1.bf16.msra.mxu0 %v2887_v50  ;;  %v1579_v26 = vsel %vm1577_vm4, %v3010_v62, %v3011_v33  ;;  %v1578_v35 = vsel %vm1577_vm4, %v1572_v41, %v3010_v62  ;;  %v1711_v33 = vld [vmem:[%s3945_s7] sm:$0xff] }
 0x366   : > { %v3019_v54 = vpop.permute.xlu1 %3018  ;;  %v1548_v55 = vpop.permute.xlu0 %1547 }
 0x367   : > { %v3020_v58 = vunpack.i.l.bf16 %v3019_v54  ;;  %v3021_v59 = vunpack.i.h.bf16 %v3019_v54 }
 0x369   : > { %v1567_v13 = vsel %vm1411_vm10, %v1562_v42, %v3020_v58  ;;  %v1568_v18 = vsel %vm1411_vm10, %v3020_v58, %v3021_v59  ;;  %v3262_v59 = vmov 0  }
 0x36a   : > { %v3024_v63 = vpop.permute.xlu1 %3023  ;;  %v3014_v5 = vpop.permute.xlu0 %3013  ;;  %3037 = vset.pattern.permute.xlu0 %v3262_v59  ;;  %3038 = vset.pattern.permute.xlu1 %v3262_v59 }
 0x36b   : > { %v3026_v6 = vunpack.i.h.bf16 %v3024_v63  ;;  %v3025_v7 = vunpack.i.l.bf16 %v3024_v63  ;;  %v3016_v8 = vunpack.i.h.bf16 %v3014_v5  ;;  %v3015_v9 = vunpack.i.l.bf16 %v3014_v5 }
 0x36d   : > { %v1554_v14 = vsel %vm1553_vm3, %v1548_v55, %v3015_v9  ;;  %v1555_v16 = vsel %vm1553_vm3, %v3015_v9, %v3016_v8  ;;  %v1593_v19 = vsel %vm1591_vm1, %v3025_v7, %v3026_v6  ;;  %v1592_v27 = vsel %vm1591_vm1, %v1586_v51, %v3025_v7 }
 0x36e   : > { %v2891_v20 = vpack.c.bf16 %v1567_v13, %v1554_v14  ;;  %v3029_v21 = vpop.permute.xlu1 %3028  ;;  %v1600_v24 = vpop.permute.xlu0 %1599  ;;  %v2889_v25 = vpack.c.bf16 %v1568_v18, %v1555_v16  ;;  %v2893_v29 = vpack.c.bf16 %v1593_v19, %v1579_v26  ;;  %v2895_v39 = vpack.c.bf16 %v1592_v27, %v1578_v35 }
 0x36f   : > { %v3031_v30 = vunpack.i.h.bf16 %v3029_v21  ;;  %v3030_v34 = vunpack.i.l.bf16 %v3029_v21  ;;  %v1710_v21 = vld [vmem:[%s3944_s6] sm:$0xff] }
 0x370   : > { %2890 = vmatprep.subr.bf16.mxu0 %v2889_v25 }
 0x371   : > { %2892 = vmatpush1.bf16.msra.mxu0 %v2891_v20  ;;  %v1617_v46 = vsel %vm1615_vm5, %v3030_v34, %v3031_v30 }
 0x372   : > { %v1610_v37 = vpop.permute.xlu1 %1609  ;;  %v3034_v38 = vpop.permute.xlu0 %3033  ;;  %2894 = vmatprep.subr.bf16.mxu0 %v2893_v29 }
 0x373   : > { %v3036_v40 = vunpack.i.h.bf16 %v3034_v38  ;;  %v3035_v42 = vunpack.i.l.bf16 %v3034_v38  ;;  %v1616_v43 = vsel %vm1615_vm5, %v1610_v37, %v3030_v34 }
 0x375   : > { %v1605_v44 = vsel %vm1409_vm9, %v1600_v24, %v3035_v42  ;;  %2896 = vmatpush1.bf16.msra.mxu0 %v2895_v39  ;;  %v1606_v45 = vsel %vm1409_vm9, %v3035_v42, %v3036_v40 }
 0x376   : > { %v2899_v47 = vpack.c.bf16 %v1616_v43, %v1605_v44  ;;  %v1628_v48 = vpop.permute.xlu1 %1627  ;;  %v1626_v49 = vpop.permute.xlu0 %1625  ;;  %v2897_v41 = vpack.c.bf16 %v1617_v46, %v1606_v45 }
 0x377   : > { %v1631_v50 = vsel %vm1629_vm6, %v1626_v49, %v1628_v48 }
 0x378   : > { %2898 = vmatprep.subr.bf16.mxu0 %v2897_v41 }
 0x379   : > { %2900 = vmatpush1.bf16.msra.mxu0 %v2899_v47 }
 0x37a   : > { %v1624_v51 = vpop.permute.xlu0 %1623  ;;  %1655 = vmatprep.subr.mxu0 %v1631_v50 }
 0x37b   : > { %v1630_v52 = vsel %vm1629_vm6, %v1624_v51, %v1626_v49 }
 0x37d   : > { %1656 = vmatpush1.msra.mxu0 %v1630_v52 }
 0x37e   : > { %2811 = vmatmul.mubr.msk.f32.vlgmr.msra.gmra.mrb[6].mxu0 %vm1635_vm7, %v1634_v53 }
 0x37f   : > { %2310 = vmatprep.mubr.f32.mxu0 %v3241_v1 }
 0x451   : > { %v1705_v54 = vpop.f32.mrb[6].mxu0 }
 0x452   : > { %v1707_v55 = vpop.f32.mrb[7].mxu0 }
 0x453   : > { %v1712_v58 = vadd.f32 %v1707_v55, %v1705_v54 }
 0x455   : > { %1713 = vadd.xlane.f32.xlu1 %v1712_v58 }
 0x466   : > { %1750 = vperm.xlu1 %3038, %v1711_v33  }
 0x4e2   : > { %v1714_v62 = vpop.xlane.xlu1 %1713 }
 0x4e3   : > { %v1715_v63 = vrot.slane %v1714_v62, 4 }
 0x4e5   : > { %v1716_v5 = vadd.f32 %v1715_v63, %v1714_v62 }
 0x4e6   : > { %v1751_v43 = vpop.permute.xlu1 %1750 }
 0x4e7   : > { %v1717_v6 = vrot.slane %v1716_v5, 2 }
 0x4e9   : > { %v1718_v7 = vadd.f32 %v1717_v6, %v1716_v5 }
 0x4eb   : > { %v1719_v8 = vrot.slane %v1718_v7, 1 }
 0x4ed   : > { %v1720_v9 = vadd.f32 %v1719_v8, %v1718_v7 }
 0x4ef   : > { %v1722_v13 = vmul.f32 0.00048828125, %v1720_v9 }
 0x4f1   : > { %v1723_v14 = vsub.f32 %v1705_v54, %v1722_v13  ;;  %v1724_v16 = vsub.f32 %v1707_v55, %v1722_v13 }
 0x4f3   : > { %v1725_v18 = vmul.f32 %v1723_v14, %v1723_v14  ;;  %v1726_v19 = vmul.f32 %v1724_v16, %v1724_v16 }
 0x4f5   : > { %v1727_v20 = vadd.f32 %v1726_v19, %v1725_v18 }
 0x4f7   : > { %1728 = vadd.xlane.f32.xlu0 %v1727_v20 }
 0x50d   : > { %1743 = vperm.xlu0 %3037, %v1710_v21  }
 0x584   : > { %v1729_v24 = vpop.xlane.xlu0 %1728 }
 0x585   : > { %v1730_v25 = vrot.slane %v1729_v24, 4 }
 0x587   : > { %v1731_v26 = vadd.f32 %v1730_v25, %v1729_v24 }
 0x589   : > { %v1732_v27 = vrot.slane %v1731_v26, 2 }
 0x58b   : > { %v1733_v29 = vadd.f32 %v1732_v27, %v1731_v26 }
 0x58c   : > { %v1744_v39 = vpop.permute.xlu0 %1743 }
 0x58d   : > { %v1734_v30 = vrot.slane %v1733_v29, 1 }
 0x58f   : > { %v1735_v34 = vadd.f32 %v1734_v30, %v1733_v29 }
 0x591   : > { %v1736_v35 = vmul.f32 0.00048828125, %v1735_v34 }
 0x593   : > { %v1737_v37 = vadd.f32 1e-05, %v1736_v35 }
 0x595   : > { %3145 = vrsqrt.f32 %v1737_v37 }
 0x59f   : > { %v3146_v38 = vpop.eup %3145 }
 0x5a0   : > { %v1739_v40 = vmul.f32 %v3146_v38, %v1723_v14  ;;  %v1740_v42 = vmul.f32 %v3146_v38, %v1724_v16 }
 0x5a2   : > { %v1746_v44 = vmul.f32 %v1744_v39, %v1739_v40  ;;  %v1747_v45 = vmul.f32 %v1744_v39, %v1740_v42 }
 0x5a4   : > { %v1753_v46 = vadd.f32 %v1751_v43, %v1746_v44  ;;  %v1754_v47 = vadd.f32 %v1751_v43, %v1747_v45 }
 0x5a6   : > { %v1757_v48 = vmul.f32 0.70710677, %v1753_v46  ;;  %v1758_v49 = vmul.f32 0.70710677, %v1754_v47 }
 0x5a8   : > { %v1759_v41 = vand.u32 2147483647, %v1757_v48  ;;  %v1760_v50 = vand.u32 2147483647, %v1758_v49  ;;  %vm1797_vm8 = vcmp.ge.f32.partialorder %v1757_v48, 0.0  ;;  %vm1798_vm13 = vcmp.ge.f32.partialorder %v1758_v49, 0.0 }
 0x5aa   : > { %v1761_v51 = vmul.f32 0.3275911, %v1759_v41  ;;  %v1762_v52 = vmul.f32 0.3275911, %v1760_v50  ;;  %v1785_v55 = vsub.f32 0.0, %v1759_v41  ;;  %v1786_v58 = vsub.f32 0.0, %v1760_v50 }
 0x5ac   : > { %v1763_v53 = vadd.f32 1.0, %v1761_v51  ;;  %v1764_v54 = vadd.f32 1.0, %v1762_v52  ;;  %v1787_v33 = vmul.f32 %v1785_v55, %v1759_v41  ;;  %v1788_v63 = vmul.f32 %v1786_v58, %v1760_v50 }
 0x5ad   : > { %v1755_v50 = vmul.f32 0.5, %v1753_v46  ;;  %v1756_v55 = vmul.f32 0.5, %v1754_v47 }
 0x5ae   : > { %3147 = vrcp.f32 %v1763_v53  ;;  %v1789_v8 = vmul.f32 1.442695, %v1787_v33  ;;  %v1791_v13 = vmul.f32 1.442695, %v1788_v63 }
 0x5af   : > { %3149 = vrcp.f32 %v1764_v54 }
 0x5b0   : > { %3151 = vpow2.f32 %v1789_v8 }
 0x5b1   : > { %3153 = vpow2.f32 %v1791_v13 }
 0x5b8   : > { %v3148_v59 = vpop.eup %3147 }
 0x5b9   : > { %v3150_v62 = vpop.eup %3149  ;;  %v1767_v5 = vmul.f32 1.0614054, %v3148_v59 }
 0x5ba   : > { %v1768_v6 = vmul.f32 1.0614054, %v3150_v62  ;;  %v3152_v35 = vpop.eup %3151 }
 0x5bb   : > { %v1769_v7 = vadd.f32 -1.4531521, %v1767_v5  ;;  %v3154_v38 = vpop.eup %3153 }
 0x5bc   : > { %v1770_v9 = vadd.f32 -1.4531521, %v1768_v6 }
 0x5bd   : > { %v1771_v14 = vmul.f32 %v3148_v59, %v1769_v7 }
 0x5be   : > { %v1772_v16 = vmul.f32 %v3150_v62, %v1770_v9 }
 0x5bf   : > { %v1773_v18 = vadd.f32 1.4214138, %v1771_v14 }
 0x5c0   : > { %v1774_v19 = vadd.f32 1.4214138, %v1772_v16 }
 0x5c1   : > { %v1775_v20 = vmul.f32 %v3148_v59, %v1773_v18 }
 0x5c2   : > { %v1776_v21 = vmul.f32 %v3150_v62, %v1774_v19 }
 0x5c3   : > { %v1777_v24 = vadd.f32 -0.28449672, %v1775_v20 }
 0x5c4   : > { %v1778_v25 = vadd.f32 -0.28449672, %v1776_v21 }
 0x5c5   : > { %v1779_v26 = vmul.f32 %v3148_v59, %v1777_v24 }
 0x5c6   : > { %v1780_v27 = vmul.f32 %v3150_v62, %v1778_v25 }
 0x5c7   : > { %v1781_v29 = vadd.f32 0.2548296, %v1779_v26 }
 0x5c8   : > { %v1782_v30 = vadd.f32 0.2548296, %v1780_v27 }
 0x5c9   : > { %v1783_v34 = vmul.f32 %v3148_v59, %v1781_v29 }
 0x5ca   : > { %v1784_v37 = vmul.f32 %v3150_v62, %v1782_v30 }
 0x5cb   : > { %v1793_v39 = vmul.f32 %v3152_v35, %v1783_v34 }
 0x5cc   : > { %v1794_v40 = vmul.f32 %v3154_v38, %v1784_v37 }
 0x5cd   : > { %v1795_v42 = vsub.f32 1.0, %v1793_v39 }
 0x5ce   : > { %v1796_v43 = vsub.f32 1.0, %v1794_v40 }
 0x5cf   : > { %v1799_v44 = vsub.f32 0.0, %v1795_v42 }
 0x5d0   : > { %v1800_v45 = vsub.f32 0.0, %v1796_v43 }
 0x5d1   : > { %v1801_v41 = vsel %vm1797_vm8, %v1795_v42, %v1799_v44  ;;  %vm2430_vm8 = vcmask 1043592  }
 0x5d2   : > { %v1803_v51 = vadd.f32 1.0, %v1801_v41  ;;  %v1802_v52 = vsel %vm1798_vm13, %v1796_v43, %v1800_v45  ;;  %vm2433_vm13 = vcmask 134144  }
 0x5d3   : > { %v1804_v54 = vadd.f32 1.0, %v1802_v52 }
 0x5d4   : > { %v1805_v53 = vmul.f32 %v1803_v51, %v1755_v50 }
 0x5d5   : > { %v1806_v58 = vmul.f32 %v1804_v54, %v1756_v55 }
 0x5d6   : > { %1809 = vrot.lane.b32.xlu1 %v1805_v53, %s3975_s22 }
 0x5da   : > { %1811 = vrot.lane.b32.xlu1 %v1806_v58, %s3975_s22  ;;  %s3999_s22 = smov 17  }
 0x648   : > { %v1810_v59 = vpop.permute.xlu1 %1809 }
 0x649   : > { %1817 = vst.msk [vmem:[#allocation2] sm:$0xff] %vm1443_vm12, %v1810_v59 }
 0x64c   : > { %v1812_v33 = vpop.permute.xlu1 %1811 }
 0x64d   : > { %1819 = vst.msk [vmem:[#allocation2 + $0x10] sm:$0xff] %vm567_vm2, %v1812_v33  ;;  %v1813_v47 = vsel %vm567_vm2, %v1810_v59, %v1812_v33 }
 0x64e   : > { %v1832_v6 = vmul.f32 %v1813_v47, %v3572_v15  ;;  %v1826_v13 = vmul.f32 %v1813_v47, %v3579_v17  ;;  %v1829_v19 = vmul.f32 %v1813_v47, %v3559_v10  ;;  %v1835_v25 = vmul.f32 %v1813_v47, %v3596_v28 }
 0x64f   : > { %v1838_v27 = vmul.f32 %v1813_v47, %v3612_v36  ;;  %v1823_v42 = vmul.f32 %v1813_v47, %v3525_v60 }
 0x650   : > { %v1820_v48 = vld [vmem:[#allocation2] sm:$0xff] }
 0x651   : > { %1843 = vrot.lane.b32.xlu1 %v1820_v48, %s3971_s23  ;;  %v1828_v46 = vmul.f32 %v1820_v48, %v3545_v4  ;;  %v1831_v62 = vmul.f32 %v1820_v48, %v3561_v11  ;;  %v1825_v8 = vmul.f32 %v1820_v48, %v3541_v2  ;;  %v1834_v21 = vmul.f32 %v1820_v48, %v3587_v23 }
 0x652   : > { %v1837_v29 = vmul.f32 %v1820_v48, %v3605_v32  ;;  %v1822_v40 = vmul.f32 %v1820_v48, %v3527_v61 }
 0x653   : > { %1869 = vrot.lane.b32.xlu0 %v1828_v46, %s3969_s26 }
 0x654   : > { %v1824_v49 = vld [vmem:[#allocation2 + $0x10] sm:$0xff] }
 0x655   : > { %1879 = vrot.lane.b32.xlu1 %v1820_v48, %s3973_s19  ;;  %v1833_v63 = vmul.f32 %v1824_v49, %v3563_v12  ;;  %v3039_v5 = vpack.i.bf16 %v1824_v49, %v1813_v47  ;;  %v1827_v9 = vmul.f32 %v1824_v49, %v3539_v0  ;;  %v1830_v16 = vmul.f32 %v1824_v49, %v3543_v3 }
 0x656   : > { %v1839_v18 = vmul.f32 %v1824_v49, %v3603_v31  ;;  %v1836_v24 = vmul.f32 %v1824_v49, %v3585_v22 }
 0x657   : > { %1892 = vrot.lane.b32.xlu0 %v1831_v62, %s3995_s18  ;;  %v3059_v7 = vpack.i.bf16 %v1833_v63, %v1832_v6  ;;  %v3049_v14 = vpack.i.bf16 %v1827_v9, %v1826_v13  ;;  %v3054_v20 = vpack.i.bf16 %v1830_v16, %v1829_v19 }
 0x658   : > { %v3069_v26 = vpack.i.bf16 %v1836_v24, %v1835_v25 }
 0x659   : > { %3040 = vrot.lane.b32.xlu1 %v3039_v5, %s3971_s23  ;;  %s4002_s23 = smov 112  }
 0x65b   : > { %3060 = vrot.lane.b32.xlu0 %v3059_v7, %s3995_s18 }
 0x65d   : > { %3045 = vrot.lane.b32.xlu1 %v3039_v5, %s3973_s19  ;;  %s4000_s19 = smov 111  }
 0x65f   : > { %3065 = vrot.lane.b32.xlu0 %v3039_v5, %s3996_s29 }
 0x661   : > { %1856 = vrot.lane.b32.xlu1 %v1825_v8, %s3997_s0 }
 0x663   : > { %1915 = vrot.lane.b32.xlu0 %v1820_v48, %s3996_s29 }
 0x665   : > { %3050 = vrot.lane.b32.xlu1 %v3049_v14, %s3997_s0 }
 0x667   : > { %1932 = vrot.lane.b32.xlu0 %v1839_v18, %s3998_s21 }
 0x669   : > { %3055 = vrot.lane.b32.xlu1 %v3054_v20, %s3969_s26  ;;  %s4001_s26 = smov 127  }
 0x66d   : > { %1905 = vrot.lane.b32.xlu1 %v1834_v21, %s3993_s30 }
 0x671   : > { %3070 = vrot.lane.b32.xlu1 %v3069_v26, %s3993_s30 }
 0x675   : > { %1930 = vrot.lane.b32.xlu1 %v1838_v27, %s3998_s21 }
 0x679   : > { %1928 = vrot.lane.b32.xlu1 %v1837_v29, %s3998_s21 }
 0x6c3   : > { %v1844_v30 = vpop.permute.xlu1 %1843 }
 0x6c5   : > { %v1870_v35 = vpop.permute.xlu0 %1869 }
 0x6c7   : > { %v1880_v34 = vpop.permute.xlu1 %1879 }
 0x6c9   : > { %v1893_v51 = vpop.permute.xlu0 %1892 }
 0x6cb   : > { %v3041_v37 = vpop.permute.xlu1 %3040 }
 0x6cc   : > { %v3043_v38 = vunpack.i.h.bf16 %v3041_v37  ;;  %v3042_v39 = vunpack.i.l.bf16 %v3041_v37 }
 0x6cd   : > { %v3061_v53 = vpop.permute.xlu0 %3060 }
 0x6ce   : > { %v1849_v43 = vsel %vm1539_vm0, %v1844_v30, %v3042_v39  ;;  %v1850_v44 = vsel %vm1539_vm0, %v3042_v39, %v3043_v38  ;;  %v3063_v46 = vunpack.i.h.bf16 %v3061_v53  ;;  %v3062_v47 = vunpack.i.l.bf16 %v3061_v53 }
 0x6cf   : > { %v2903_v45 = vpack.c.bf16 %v1849_v43, %v1822_v40  ;;  %v3046_v41 = vpop.permute.xlu1 %3045  ;;  %v2901_v50 = vpack.c.bf16 %v1850_v44, %v1823_v42 }
 0x6d0   : > { %v3048_v55 = vunpack.i.h.bf16 %v3046_v41  ;;  %v3047_v58 = vunpack.i.l.bf16 %v3046_v41  ;;  %v1899_v18 = vsel %vm1591_vm1, %v3062_v47, %v3063_v46  ;;  %v1898_v25 = vsel %vm1591_vm1, %v1893_v51, %v3062_v47  ;;  %v1938_v51 = vld [vmem:[%s3946_s8] sm:$0xff] }
 0x6d1   : > { %2902 = vmatprep.subr.bf16.mxu1 %v2901_v50  ;;  %v3066_v63 = vpop.permute.xlu0 %3065 }
 0x6d2   : > { %2904 = vmatpush1.bf16.msra.mxu1 %v2903_v45  ;;  %v1886_v5 = vsel %vm1577_vm4, %v3047_v58, %v3048_v55  ;;  %v1885_v19 = vsel %vm1577_vm4, %v1880_v34, %v3047_v58  ;;  %v3068_v21 = vunpack.i.h.bf16 %v3066_v63  ;;  %v3067_v24 = vunpack.i.l.bf16 %v3066_v63  ;;  %v2013_v55 = vld [vmem:[%s3947_s9] sm:$0xff] }
 0x6d3   : > { %v1857_v52 = vpop.permute.xlu1 %1856  ;;  %v2909_v20 = vpack.c.bf16 %v1899_v18, %v1886_v5  ;;  %v2911_v29 = vpack.c.bf16 %v1898_v25, %v1885_v19 }
 0x6d4   : > { %v1922_v39 = vsel %vm1615_vm5, %v3067_v24, %v3068_v21 }
 0x6d5   : > { %v1916_v26 = vpop.permute.xlu0 %1915 }
 0x6d6   : > { %v1921_v37 = vsel %vm1615_vm5, %v1916_v26, %v3067_v24 }
 0x6d7   : > { %v3051_v54 = vpop.permute.xlu1 %3050 }
 0x6d8   : > { %v3053_v59 = vunpack.i.h.bf16 %v3051_v54  ;;  %v3052_v33 = vunpack.i.l.bf16 %v3051_v54 }
 0x6d9   : > { %v1933_v44 = vpop.permute.xlu0 %1932 }
 0x6da   : > { %v1862_v6 = vsel %vm1553_vm3, %v1857_v52, %v3052_v33  ;;  %v1863_v8 = vsel %vm1553_vm3, %v3052_v33, %v3053_v59 }
 0x6db   : > { %v3056_v48 = vpop.permute.xlu1 %3055 }
 0x6dc   : > { %v3058_v49 = vunpack.i.h.bf16 %v3056_v48  ;;  %v3057_v62 = vunpack.i.l.bf16 %v3056_v48 }
 0x6de   : > { %v1875_v7 = vsel %vm1411_vm10, %v1870_v35, %v3057_v62  ;;  %v1876_v9 = vsel %vm1411_vm10, %v3057_v62, %v3058_v49 }
 0x6df   : > { %v2907_v13 = vpack.c.bf16 %v1875_v7, %v1862_v6  ;;  %v1906_v14 = vpop.permute.xlu1 %1905  ;;  %v2905_v16 = vpack.c.bf16 %v1876_v9, %v1863_v8  ;;  %v2014_v8 = vld [vmem:[%s3948_s10] sm:$0xff] }
 0x6e1   : > { %2906 = vmatprep.subr.bf16.mxu1 %v2905_v16 }
 0x6e2   : > { %2908 = vmatpush1.bf16.msra.mxu1 %v2907_v13 }
 0x6e3   : > { %v3071_v27 = vpop.permute.xlu1 %3070  ;;  %2910 = vmatprep.subr.bf16.mxu1 %v2909_v20 }
 0x6e4   : > { %v3073_v30 = vunpack.i.h.bf16 %v3071_v27  ;;  %v3072_v35 = vunpack.i.l.bf16 %v3071_v27 }
 0x6e6   : > { %v1911_v38 = vsel %vm1409_vm9, %v1906_v14, %v3072_v35  ;;  %2912 = vmatpush1.bf16.msra.mxu1 %v2911_v29  ;;  %v1912_v34 = vsel %vm1409_vm9, %v3072_v35, %v3073_v30 }
 0x6e7   : > { %v2915_v40 = vpack.c.bf16 %v1921_v37, %v1911_v38  ;;  %v1931_v42 = vpop.permute.xlu1 %1930  ;;  %v2913_v43 = vpack.c.bf16 %v1922_v39, %v1912_v34 }
 0x6e8   : > { %v1935_v45 = vsel %vm1629_vm6, %v1931_v42, %v1933_v44 }
 0x6e9   : > { %2914 = vmatprep.subr.bf16.mxu1 %v2913_v43 }
 0x6ea   : > { %2916 = vmatpush1.bf16.msra.mxu1 %v2915_v40 }
 0x6eb   : > { %v1929_v41 = vpop.permute.xlu1 %1928  ;;  %1958 = vmatprep.subr.mxu1 %v1935_v45 }
 0x6ec   : > { %v1934_v50 = vsel %vm1629_vm6, %v1929_v41, %v1931_v42 }
 0x6ee   : > { %1959 = vmatpush1.msra.mxu1 %v1934_v50 }
 0x6ef   : > { %2812 = vmatmul.mubr.msk.f32.vlgmr.msra.gmra.mrb[10].mxu1 %vm1635_vm7, %v1938_v51 }
 0x6f0   : > { %2641 = vmatprep.mubr.f32.mxu1 %v3241_v1 }
 0x7c2   : > { %v2008_v52 = vpop.f32.mrb[10].mxu1 }
 0x7c3   : > { %v2010_v53 = vpop.f32.mrb[11].mxu1 }
 0x7c4   : > { %v2015_v54 = vadd.f32 %v2010_v53, %v2008_v52 }
 0x7c6   : > { %2016 = vadd.xlane.f32.xlu0 %v2015_v54 }
 0x7dc   : > { %2045 = vperm.xlu0 %3037, %v2013_v55  }
 0x853   : > { %v2017_v58 = vpop.xlane.xlu0 %2016 }
 0x854   : > { %v2018_v59 = vrot.slane %v2017_v58, 4 }
 0x856   : > { %v2019_v33 = vadd.f32 %v2018_v59, %v2017_v58 }
 0x858   : > { %v2020_v48 = vrot.slane %v2019_v33, 2 }
 0x85a   : > { %v2021_v46 = vadd.f32 %v2020_v48, %v2019_v33 }
 0x85b   : > { %v2046_v29 = vpop.permute.xlu0 %2045 }
 0x85c   : > { %v2022_v47 = vrot.slane %v2021_v46, 1 }
 0x85e   : > { %v2023_v49 = vadd.f32 %v2022_v47, %v2021_v46 }
 0x860   : > { %v2024_v62 = vmul.f32 0.00048828125, %v2023_v49 }
 0x862   : > { %v2025_v63 = vsub.f32 %v2008_v52, %v2024_v62  ;;  %v2026_v5 = vsub.f32 %v2010_v53, %v2024_v62 }
 0x864   : > { %v2027_v1 = vmul.f32 %v2025_v63, %v2025_v63  ;;  %v2028_v6 = vmul.f32 %v2026_v5, %v2026_v5 }
 0x866   : > { %v2029_v7 = vadd.f32 %v2028_v6, %v2027_v1 }
 0x868   : > { %2030 = vadd.xlane.f32.xlu1 %v2029_v7 }
 0x879   : > { %2052 = vperm.xlu1 %3038, %v2014_v8  }
 0x8f5   : > { %v2031_v9 = vpop.xlane.xlu1 %2030 }
 0x8f6   : > { %v2032_v13 = vrot.slane %v2031_v9, 4 }
 0x8f8   : > { %v2033_v14 = vadd.f32 %v2032_v13, %v2031_v9 }
 0x8f9   : > { %v2053_v37 = vpop.permute.xlu1 %2052 }
 0x8fa   : > { %v2034_v16 = vrot.slane %v2033_v14, 2 }
 0x8fc   : > { %v2035_v18 = vadd.f32 %v2034_v16, %v2033_v14 }
 0x8fe   : > { %v2036_v19 = vrot.slane %v2035_v18, 1 }
 0x900   : > { %v2037_v20 = vadd.f32 %v2036_v19, %v2035_v18 }
 0x902   : > { %v2038_v21 = vmul.f32 0.00048828125, %v2037_v20 }
 0x904   : > { %v2039_v24 = vadd.f32 1e-05, %v2038_v21 }
 0x906   : > { %3155 = vrsqrt.f32 %v2039_v24 }
 0x910   : > { %v3156_v25 = vpop.eup %3155 }
 0x911   : > { %v2041_v26 = vmul.f32 %v3156_v25, %v2025_v63  ;;  %v2042_v27 = vmul.f32 %v3156_v25, %v2026_v5 }
 0x913   : > { %v2048_v30 = vmul.f32 %v2046_v29, %v2041_v26  ;;  %v2049_v35 = vmul.f32 %v2046_v29, %v2042_v27 }
 0x915   : > { %v2055_v38 = vadd.f32 %v2053_v37, %v2048_v30  ;;  %v2056_v34 = vadd.f32 %v2053_v37, %v2049_v35 }
 0x917   : > { %v2057_v39 = vadd.f32 %v2055_v38, %v3518_v57  ;;  %v2058_v40 = vadd.f32 %v2056_v34, %v3513_v56 }
 0x919   : > { %v2061_v42 = vmul.f32 0.70710677, %v2057_v39  ;;  %v2062_v43 = vmul.f32 0.70710677, %v2058_v40  ;;  %v2059_v38 = vmul.f32 0.5, %v2057_v39 }
 0x91b   : > { %v2063_v44 = vand.u32 2147483647, %v2061_v42  ;;  %v2064_v45 = vand.u32 2147483647, %v2062_v43  ;;  %vm2101_vm14 = vcmp.ge.f32.partialorder %v2061_v42, 0.0  ;;  %vm2102_vm15 = vcmp.ge.f32.partialorder %v2062_v43, 0.0 }
 0x91d   : > { %v2065_v41 = vmul.f32 0.3275911, %v2063_v44  ;;  %v2066_v50 = vmul.f32 0.3275911, %v2064_v45  ;;  %v2089_v53 = vsub.f32 0.0, %v2063_v44  ;;  %v2090_v54 = vsub.f32 0.0, %v2064_v45 }
 0x91f   : > { %v2067_v51 = vadd.f32 1.0, %v2065_v41  ;;  %v2068_v52 = vadd.f32 1.0, %v2066_v50  ;;  %v2091_v58 = vmul.f32 %v2089_v53, %v2063_v44  ;;  %v2092_v33 = vmul.f32 %v2090_v54, %v2064_v45 }
 0x920   : > { %v2060_v45 = vmul.f32 0.5, %v2058_v40 }
 0x921   : > { %3157 = vrcp.f32 %v2067_v51  ;;  %v2093_v56 = vmul.f32 1.442695, %v2091_v58  ;;  %v2095_v49 = vmul.f32 1.442695, %v2092_v33 }
 0x922   : > { %3159 = vrcp.f32 %v2068_v52 }
 0x923   : > { %3161 = vpow2.f32 %v2093_v56 }
 0x924   : > { %3163 = vpow2.f32 %v2095_v49 }
 0x92b   : > { %v3158_v55 = vpop.eup %3157 }
 0x92c   : > { %v3160_v59 = vpop.eup %3159  ;;  %v2071_v48 = vmul.f32 1.0614054, %v3158_v55 }
 0x92d   : > { %v2072_v57 = vmul.f32 1.0614054, %v3160_v59  ;;  %v3162_v20 = vpop.eup %3161 }
 0x92e   : > { %v2073_v46 = vadd.f32 -1.4531521, %v2071_v48  ;;  %v3164_v24 = vpop.eup %3163 }
 0x92f   : > { %v2074_v47 = vadd.f32 -1.4531521, %v2072_v57 }
 0x930   : > { %v2075_v62 = vmul.f32 %v3158_v55, %v2073_v46 }
 0x931   : > { %v2076_v63 = vmul.f32 %v3160_v59, %v2074_v47 }
 0x932   : > { %v2077_v5 = vadd.f32 1.4214138, %v2075_v62 }
 0x933   : > { %v2078_v1 = vadd.f32 1.4214138, %v2076_v63 }
 0x934   : > { %v2079_v6 = vmul.f32 %v3158_v55, %v2077_v5 }
 0x935   : > { %v2080_v7 = vmul.f32 %v3160_v59, %v2078_v1 }
 0x936   : > { %v2081_v8 = vadd.f32 -0.28449672, %v2079_v6 }
 0x937   : > { %v2082_v9 = vadd.f32 -0.28449672, %v2080_v7 }
 0x938   : > { %v2083_v13 = vmul.f32 %v3158_v55, %v2081_v8 }
 0x939   : > { %v2084_v14 = vmul.f32 %v3160_v59, %v2082_v9 }
 0x93a   : > { %v2085_v16 = vadd.f32 0.2548296, %v2083_v13 }
 0x93b   : > { %v2086_v18 = vadd.f32 0.2548296, %v2084_v14 }
 0x93c   : > { %v2087_v19 = vmul.f32 %v3158_v55, %v2085_v16 }
 0x93d   : > { %v2088_v21 = vmul.f32 %v3160_v59, %v2086_v18 }
 0x93e   : > { %v2097_v25 = vmul.f32 %v3162_v20, %v2087_v19 }
 0x93f   : > { %v2098_v26 = vmul.f32 %v3164_v24, %v2088_v21 }
 0x940   : > { %v2099_v27 = vsub.f32 1.0, %v2097_v25 }
 0x941   : > { %v2100_v29 = vsub.f32 1.0, %v2098_v26 }
 0x942   : > { %v2103_v30 = vsub.f32 0.0, %v2099_v27 }
 0x943   : > { %v2104_v35 = vsub.f32 0.0, %v2100_v29 }
 0x944   : > { %v2105_v37 = vsel %vm2101_vm14, %v2099_v27, %v2103_v30 }
 0x945   : > { %v2106_v34 = vsel %vm2102_vm15, %v2100_v29, %v2104_v35  ;;  %v2107_v44 = vadd.f32 1.0, %v2105_v37 }
 0x946   : > { %v2108_v41 = vadd.f32 1.0, %v2106_v34 }
 0x947   : > { %v2109_v50 = vmul.f32 %v2107_v44, %v2059_v38 }
 0x948   : > { %v2110_v51 = vmul.f32 %v2108_v41, %v2060_v45 }
 0x949   : > { %2113 = vrot.lane.b32.xlu0 %v2109_v50, %s3999_s22 }
 0x94a   : > { %2115 = vrot.lane.b32.xlu1 %v2110_v51, %s3999_s22 }
 0x9bb   : > { %v2114_v52 = vpop.permute.xlu0 %2113 }
 0x9bc   : > { %v2116_v53 = vpop.permute.xlu1 %2115  ;;  %2121 = vst.msk [vmem:[#allocation2] sm:$0xff] %vm1443_vm12, %v2114_v52 }
 0x9bd   : > { %2123 = vst.msk [vmem:[#allocation2 + $0x10] sm:$0xff] %vm567_vm2, %v2116_v53  ;;  %v2117_v42 = vsel %vm567_vm2, %v2114_v52, %v2116_v53 }
 0x9be   : > { %2122 = vst [vmem:[#allocation2 + $0x8] sm:$0xff] %v2117_v42  ;;  %v2133_v59 = vmul.f32 %v2117_v42, %v3559_v10  ;;  %v2136_v56 = vmul.f32 %v2117_v42, %v3572_v15  ;;  %v2130_v47 = vmul.f32 %v2117_v42, %v3579_v17  ;;  %v2139_v1 = vmul.f32 %v2117_v42, %v3596_v28 }
 0x9bf   : > { %v2142_v8 = vmul.f32 %v2117_v42, %v3612_v36  ;;  %v2127_v24 = vmul.f32 %v2117_v42, %v3525_v60 }
 0x9c3   : > { %v2124_v39 = vld [vmem:[#allocation2] sm:$0xff] }
 0x9c4   : > { %2183 = vrot.lane.b32.xlu0 %v2124_v39, %s4000_s19  ;;  %2147 = vrot.lane.b32.xlu1 %v2124_v39, %s4001_s26  ;;  %v2128_v40 = vld [vmem:[#allocation2 + $0x10] sm:$0xff]  ;;  %v2132_v43 = vmul.f32 %v2124_v39, %v3545_v4  ;;  %v2135_v55 = vmul.f32 %v2124_v39, %v3561_v11  ;;  %v2129_v33 = vmul.f32 %v2124_v39, %v3541_v2 }
 0x9c5   : > { %v3074_v54 = vpack.i.bf16 %v2128_v40, %v2117_v42  ;;  %v2134_v58 = vmul.f32 %v2128_v40, %v3543_v3  ;;  %v2137_v57 = vmul.f32 %v2128_v40, %v3563_v12  ;;  %v2131_v46 = vmul.f32 %v2128_v40, %v3539_v0 }
 0x9c6   : > { %v2138_v63 = vmul.f32 %v2124_v39, %v3587_v23  ;;  %v2140_v5 = vmul.f32 %v2128_v40, %v3585_v22  ;;  %v2143_v7 = vmul.f32 %v2128_v40, %v3603_v31  ;;  %v2141_v9 = vmul.f32 %v2124_v39, %v3605_v32 }
 0x9c7   : > { %v3089_v48 = vpack.i.bf16 %v2134_v58, %v2133_v59  ;;  %v3094_v49 = vpack.i.bf16 %v2137_v57, %v2136_v56  ;;  %v3084_v62 = vpack.i.bf16 %v2131_v46, %v2130_v47  ;;  %v2126_v21 = vmul.f32 %v2124_v39, %v3527_v61 }
 0x9c8   : > { %2173 = vrot.lane.b32.xlu1 %v2132_v43, %s4002_s23  ;;  %3075 = vrot.lane.b32.xlu0 %v3074_v54, %s4001_s26  ;;  %v3104_v6 = vpack.i.bf16 %v2140_v5, %v2139_v1 }
 0x9cc   : > { %2196 = vrot.lane.b32.xlu1 %v2135_v55, %s3995_s18  ;;  %3080 = vrot.lane.b32.xlu0 %v3074_v54, %s4000_s19 }
 0x9d0   : > { %2160 = vrot.lane.b32.xlu0 %v2129_v33, %s3997_s0  ;;  %3090 = vrot.lane.b32.xlu1 %v3089_v48, %s4002_s23 }
 0x9d4   : > { %3095 = vrot.lane.b32.xlu1 %v3094_v49, %s3995_s18  ;;  %3085 = vrot.lane.b32.xlu0 %v3084_v62, %s3997_s0 }
 0x9d8   : > { %3100 = vrot.lane.b32.xlu1 %v3074_v54, %s3996_s29  ;;  %2209 = vrot.lane.b32.xlu0 %v2138_v63, %s3993_s30 }
 0x9dc   : > { %2219 = vrot.lane.b32.xlu1 %v2124_v39, %s3996_s29  ;;  %3105 = vrot.lane.b32.xlu0 %v3104_v6, %s3993_s30 }
 0x9e0   : > { %2236 = vrot.lane.b32.xlu1 %v2143_v7, %s3998_s21  ;;  %2234 = vrot.lane.b32.xlu0 %v2142_v8, %s3998_s21 }
 0x9e4   : > { %2232 = vrot.lane.b32.xlu0 %v2141_v9, %s3998_s21 }
 0xa36   : > { %v2184_v13 = vpop.permute.xlu0 %2183  ;;  %v2148_v14 = vpop.permute.xlu1 %2147 }
 0xa3a   : > { %v2174_v16 = vpop.permute.xlu1 %2173  ;;  %v3076_v18 = vpop.permute.xlu0 %3075 }
 0xa3b   : > { %v3078_v19 = vunpack.i.h.bf16 %v3076_v18  ;;  %v3077_v20 = vunpack.i.l.bf16 %v3076_v18 }
 0xa3d   : > { %v2153_v25 = vsel %vm1539_vm0, %v2148_v14, %v3077_v20  ;;  %v2154_v26 = vsel %vm1539_vm0, %v3077_v20, %v3078_v19 }
 0xa3e   : > { %v2919_v27 = vpack.c.bf16 %v2153_v25, %v2126_v21  ;;  %v2197_v29 = vpop.permute.xlu1 %2196  ;;  %v3081_v30 = vpop.permute.xlu0 %3080  ;;  %v2917_v35 = vpack.c.bf16 %v2154_v26, %v2127_v24 }
 0xa3f   : > { %v3083_v45 = vunpack.i.h.bf16 %v3081_v30  ;;  %v3082_v41 = vunpack.i.l.bf16 %v3081_v30 }
 0xa40   : > { %2918 = vmatprep.subr.bf16.mxu0 %v2917_v35 }
 0xa41   : > { %2920 = vmatpush1.bf16.msra.mxu0 %v2919_v27  ;;  %v2190_v46 = vsel %vm1577_vm4, %v3082_v41, %v3083_v45  ;;  %v2189_v63 = vsel %vm1577_vm4, %v2184_v13, %v3082_v41  ;;  %v2242_v27 = vld [vmem:[%s3949_s11] sm:$0xf] }
 0xa42   : > { %v2161_v37 = vpop.permute.xlu0 %2160  ;;  %v3091_v38 = vpop.permute.xlu1 %3090 }
 0xa43   : > { %v3092_v34 = vunpack.i.l.bf16 %v3091_v38  ;;  %v3093_v44 = vunpack.i.h.bf16 %v3091_v38 }
 0xa45   : > { %v2179_v40 = vsel %vm1411_vm10, %v2174_v16, %v3092_v34  ;;  %v2180_v55 = vsel %vm1411_vm10, %v3092_v34, %v3093_v44  ;;  %v2318_v34 = vld [vmem:[%s3951_s13] sm:$0xf] }
 0xa46   : > { %v3096_v50 = vpop.permute.xlu1 %3095  ;;  %v3086_v51 = vpop.permute.xlu0 %3085 }
 0xa47   : > { %v3098_v52 = vunpack.i.h.bf16 %v3096_v50  ;;  %v3097_v53 = vunpack.i.l.bf16 %v3096_v50  ;;  %v3088_v42 = vunpack.i.h.bf16 %v3086_v51  ;;  %v3087_v39 = vunpack.i.l.bf16 %v3086_v51 }
 0xa49   : > { %v2166_v43 = vsel %vm1553_vm3, %v2161_v37, %v3087_v39  ;;  %v2167_v54 = vsel %vm1553_vm3, %v3087_v39, %v3088_v42  ;;  %v2203_v58 = vsel %vm1591_vm1, %v3097_v53, %v3098_v52  ;;  %v2202_v56 = vsel %vm1591_vm1, %v2197_v29, %v3097_v53 }
 0xa4a   : > { %v2923_v59 = vpack.c.bf16 %v2179_v40, %v2166_v43  ;;  %v3101_v33 = vpop.permute.xlu1 %3100  ;;  %v2210_v48 = vpop.permute.xlu0 %2209  ;;  %v2921_v57 = vpack.c.bf16 %v2180_v55, %v2167_v54  ;;  %v2925_v47 = vpack.c.bf16 %v2203_v58, %v2190_v46  ;;  %v2927_v6 = vpack.c.bf16 %v2202_v56, %v2189_v63 }
 0xa4b   : > { %v3103_v49 = vunpack.i.h.bf16 %v3101_v33  ;;  %v3102_v62 = vunpack.i.l.bf16 %v3101_v33 }
 0xa4c   : > { %2922 = vmatprep.subr.bf16.mxu0 %v2921_v57 }
 0xa4d   : > { %2924 = vmatpush1.bf16.msra.mxu0 %v2923_v59  ;;  %v2226_v18 = vsel %vm1615_vm5, %v3102_v62, %v3103_v49 }
 0xa4e   : > { %v2220_v5 = vpop.permute.xlu1 %2219  ;;  %v3106_v1 = vpop.permute.xlu0 %3105  ;;  %2926 = vmatprep.subr.bf16.mxu0 %v2925_v47 }
 0xa4f   : > { %v3108_v7 = vunpack.i.h.bf16 %v3106_v1  ;;  %v3107_v8 = vunpack.i.l.bf16 %v3106_v1  ;;  %v2225_v9 = vsel %vm1615_vm5, %v2220_v5, %v3102_v62 }
 0xa51   : > { %v2215_v14 = vsel %vm1409_vm9, %v2210_v48, %v3107_v8  ;;  %2928 = vmatpush1.bf16.msra.mxu0 %v2927_v6  ;;  %v2216_v16 = vsel %vm1409_vm9, %v3107_v8, %v3108_v7  ;;  %v2317_v48 = vld [vmem:[%s3950_s12] sm:$0xf] }
 0xa52   : > { %v2931_v19 = vpack.c.bf16 %v2225_v9, %v2215_v14  ;;  %v2237_v20 = vpop.permute.xlu1 %2236  ;;  %v2235_v21 = vpop.permute.xlu0 %2234  ;;  %v2929_v24 = vpack.c.bf16 %v2226_v18, %v2216_v16 }
 0xa53   : > { %v2239_v13 = vsel %vm1629_vm6, %v2235_v21, %v2237_v20 }
 0xa54   : > { %2930 = vmatprep.subr.bf16.mxu0 %v2929_v24 }
 0xa55   : > { %2932 = vmatpush1.bf16.msra.mxu0 %v2931_v19 }
 0xa56   : > { %v2233_v25 = vpop.permute.xlu0 %2232  ;;  %2262 = vmatprep.subr.mxu0 %v2239_v13 }
 0xa57   : > { %v2238_v26 = vsel %vm1629_vm6, %v2233_v25, %v2235_v21 }
 0xa59   : > { %2263 = vmatpush1.msra.mxu0 %v2238_v26 }
 0xa5a   : > { %2813 = vmatmul.mubr.msk.f32.vlgmr.msra.gmra.mrb[8].mxu0 %vm1635_vm7, %v2242_v27 }
 0xb2d   : > { %v2312_v29 = vpop.f32.mrb[8].mxu0 }
 0xb2e   : > { %v2319_v30 = vsel %vm1430_vm11, %v2312_v29, 0.0  ;;  %v2314_v35 = vpop.f32.mrb[9].mxu0 }
 0xb2f   : > { %v2320_v37 = vsel %vm1430_vm11, %v2314_v35, 0.0 }
 0xb30   : > { %v2321_v38 = vadd.f32 %v2320_v37, %v2319_v30 }
 0xb32   : > { %2322 = vadd.xlane.f32.xlu1 %v2321_v38 }
 0xb43   : > { %2363 = vperm.xlu1 %3038, %v2318_v34  }
 0xbbf   : > { %v2323_v44 = vpop.xlane.xlu1 %2322 }
 0xbc0   : > { %v2324_v45 = vsel %vm1430_vm11, %v2323_v44, 0.0 }
 0xbc1   : > { %v2325_v41 = vrot.slane %v2324_v45, 4 }
 0xbc3   : > { %v2326_v50 = vadd.f32 %v2325_v41, %v2324_v45  ;;  %v2364_v19 = vpop.permute.xlu1 %2363 }
 0xbc5   : > { %v2327_v51 = vrot.slane %v2326_v50, 2 }
 0xbc7   : > { %v2328_v52 = vadd.f32 %v2327_v51, %v2326_v50 }
 0xbc9   : > { %v2329_v53 = vrot.slane %v2328_v52, 1 }
 0xbcb   : > { %v2330_v42 = vadd.f32 %v2329_v53, %v2328_v52 }
 0xbcd   : > { %v2332_v39 = vmul.f32 0.0009765625, %v2330_v42 }
 0xbcf   : > { %v2333_v40 = vsub.f32 %v2312_v29, %v2332_v39  ;;  %v2334_v43 = vsub.f32 %v2314_v35, %v2332_v39 }
 0xbd1   : > { %v2335_v54 = vmul.f32 %v2333_v40, %v2333_v40  ;;  %v2336_v55 = vmul.f32 %v2334_v43, %v2334_v43 }
 0xbd3   : > { %v2337_v58 = vsel %vm1430_vm11, %v2335_v54, 0.0  ;;  %v2338_v59 = vsel %vm1430_vm11, %v2336_v55, 0.0 }
 0xbd4   : > { %v2339_v33 = vadd.f32 %v2338_v59, %v2337_v58 }
 0xbd6   : > { %2340 = vadd.xlane.f32.xlu0 %v2339_v33 }
 0xbec   : > { %2356 = vperm.xlu0 %3037, %v2317_v48  }
 0xc63   : > { %v2341_v57 = vpop.xlane.xlu0 %2340 }
 0xc64   : > { %v2342_v46 = vsel %vm1430_vm11, %v2341_v57, 0.0 }
 0xc65   : > { %v2343_v56 = vrot.slane %v2342_v46, 4 }
 0xc67   : > { %v2344_v47 = vadd.f32 %v2343_v56, %v2342_v46 }
 0xc69   : > { %v2345_v49 = vrot.slane %v2344_v47, 2 }
 0xc6b   : > { %v2346_v62 = vadd.f32 %v2345_v49, %v2344_v47  ;;  %v2357_v14 = vpop.permute.xlu0 %2356 }
 0xc6d   : > { %v2347_v63 = vrot.slane %v2346_v62, 1 }
 0xc6f   : > { %v2348_v5 = vadd.f32 %v2347_v63, %v2346_v62 }
 0xc71   : > { %v2349_v1 = vmul.f32 0.0009765625, %v2348_v5 }
 0xc73   : > { %v2350_v6 = vadd.f32 1e-05, %v2349_v1 }
 0xc75   : > { %3165 = vrsqrt.f32 %v2350_v6 }
 0xc7f   : > { %v3166_v7 = vpop.eup %3165 }
 0xc80   : > { %v2352_v8 = vmul.f32 %v3166_v7, %v2333_v40  ;;  %v2353_v9 = vmul.f32 %v3166_v7, %v2334_v43 }
 0xc82   : > { %v2359_v16 = vmul.f32 %v2357_v14, %v2352_v8  ;;  %v2360_v18 = vmul.f32 %v2357_v14, %v2353_v9 }
 0xc84   : > { %v2366_v20 = vadd.f32 %v2364_v19, %v2359_v16  ;;  %v2367_v21 = vadd.f32 %v2364_v19, %v2360_v18 }
 0xc86   : > { %v2370_v24 = vmul.f32 0.70710677, %v2366_v20  ;;  %v2371_v13 = vmul.f32 0.70710677, %v2367_v21  ;;  %v2368_v18 = vmul.f32 0.5, %v2366_v20 }
 0xc88   : > { %v2372_v25 = vand.u32 2147483647, %v2370_v24  ;;  %v2373_v26 = vand.u32 2147483647, %v2371_v13  ;;  %vm2410_vm12 = vcmp.ge.f32.partialorder %v2370_v24, 0.0  ;;  %vm2411_vm7 = vcmp.ge.f32.partialorder %v2371_v13, 0.0 }
 0xc8a   : > { %v2374_v27 = vmul.f32 0.3275911, %v2372_v25  ;;  %v2375_v29 = vmul.f32 0.3275911, %v2373_v26  ;;  %v2398_v37 = vsub.f32 0.0, %v2372_v25  ;;  %v2399_v38 = vsub.f32 0.0, %v2373_v26 }
 0xc8c   : > { %v2376_v30 = vadd.f32 1.0, %v2374_v27  ;;  %v2377_v35 = vadd.f32 1.0, %v2375_v29  ;;  %v2400_v44 = vmul.f32 %v2398_v37, %v2372_v25  ;;  %v2401_v41 = vmul.f32 %v2399_v38, %v2373_v26 }
 0xc8d   : > { %v2369_v26 = vmul.f32 0.5, %v2367_v21 }
 0xc8e   : > { %3167 = vrcp.f32 %v2376_v30  ;;  %v2402_v53 = vmul.f32 1.442695, %v2400_v44  ;;  %v2404_v39 = vmul.f32 1.442695, %v2401_v41 }
 0xc8f   : > { %3169 = vrcp.f32 %v2377_v35 }
 0xc90   : > { %3171 = vpow2.f32 %v2402_v53 }
 0xc91   : > { %3173 = vpow2.f32 %v2404_v39 }
 0xc98   : > { %v3168_v34 = vpop.eup %3167 }
 0xc99   : > { %v3170_v45 = vpop.eup %3169  ;;  %v2380_v50 = vmul.f32 1.0614054, %v3168_v34 }
 0xc9a   : > { %v2381_v51 = vmul.f32 1.0614054, %v3170_v45  ;;  %v3172_v62 = vpop.eup %3171 }
 0xc9b   : > { %v2382_v52 = vadd.f32 -1.4531521, %v2380_v50  ;;  %v3174_v5 = vpop.eup %3173 }
 0xc9c   : > { %v2383_v42 = vadd.f32 -1.4531521, %v2381_v51 }
 0xc9d   : > { %v2384_v40 = vmul.f32 %v3168_v34, %v2382_v52 }
 0xc9e   : > { %v2385_v43 = vmul.f32 %v3170_v45, %v2383_v42 }
 0xc9f   : > { %v2386_v54 = vadd.f32 1.4214138, %v2384_v40 }
 0xca0   : > { %v2387_v55 = vadd.f32 1.4214138, %v2385_v43 }
 0xca1   : > { %v2388_v58 = vmul.f32 %v3168_v34, %v2386_v54 }
 0xca2   : > { %v2389_v59 = vmul.f32 %v3170_v45, %v2387_v55 }
 0xca3   : > { %v2390_v33 = vadd.f32 -0.28449672, %v2388_v58 }
 0xca4   : > { %v2391_v48 = vadd.f32 -0.28449672, %v2389_v59 }
 0xca5   : > { %v2392_v57 = vmul.f32 %v3168_v34, %v2390_v33 }
 0xca6   : > { %v2393_v46 = vmul.f32 %v3170_v45, %v2391_v48 }
 0xca7   : > { %v2394_v56 = vadd.f32 0.2548296, %v2392_v57 }
 0xca8   : > { %v2395_v47 = vadd.f32 0.2548296, %v2393_v46 }
 0xca9   : > { %v2396_v49 = vmul.f32 %v3168_v34, %v2394_v56 }
 0xcaa   : > { %v2397_v63 = vmul.f32 %v3170_v45, %v2395_v47 }
 0xcab   : > { %v2406_v1 = vmul.f32 %v3172_v62, %v2396_v49 }
 0xcac   : > { %v2407_v6 = vmul.f32 %v3174_v5, %v2397_v63 }
 0xcad   : > { %v2408_v7 = vsub.f32 1.0, %v2406_v1 }
 0xcae   : > { %v2409_v8 = vsub.f32 1.0, %v2407_v6 }
 0xcaf   : > { %v2412_v9 = vsub.f32 0.0, %v2408_v7 }
 0xcb0   : > { %v2413_v14 = vsub.f32 0.0, %v2409_v8 }
 0xcb1   : > { %v2414_v16 = vsel %vm2410_vm12, %v2408_v7, %v2412_v9 }
 0xcb2   : > { %v2415_v19 = vsel %vm2411_vm7, %v2409_v8, %v2413_v14  ;;  %v2416_v25 = vadd.f32 1.0, %v2414_v16 }
 0xcb3   : > { %v2417_v27 = vadd.f32 1.0, %v2415_v19 }
 0xcb4   : > { %v2418_v29 = vmul.f32 %v2416_v25, %v2368_v18 }
 0xcb5   : > { %v2419_v30 = vmul.f32 %v2417_v27, %v2369_v26 }
 0xcb6   : > { %2422 = vrot.lane.b32.xlu1 %v2418_v29, %s3999_s22 }
 0xcb7   : > { %2424 = vrot.lane.b32.xlu0 %v2419_v30, %s3999_s22 }
 0xd28   : > { %v2423_v35 = vpop.permute.xlu1 %2422 }
 0xd29   : > { %v2425_v37 = vpop.permute.xlu0 %2424  ;;  %2431 = vst.msk [vmem:[#allocation2] sm:$0xf] %vm2430_vm8, %v2423_v35 }
 0xd2a   : > { %2434 = vst.msk [vmem:[#allocation2 + $0x10] sm:$0xf] %vm2433_vm13, %v2425_v37  ;;  %v2426_v24 = vsel %vm567_vm2, %v2423_v35, %v2425_v37  ;;  %vm2569_vm2 = vcmask 293888  }
 0xd2b   : > { %2432 = vst [vmem:[#allocation2 + $0x8] sm:$0xf] %v2426_v24 }
 0xd30   : > { %v3796_v20 = vld [vmem:[#allocation2] sm:$0xf] }
 0xd31   : > { %2500 = vrot.lane.b32.xlu1 %v3796_v20, %s4000_s19  ;;  %v2458_v21 = vrot.slane %v3796_v20, 4  ;;  %v2439_v13 = vld [vmem:[#allocation2 + $0x10] sm:$0xf]  ;;  %v2440_v52 = vmul.f32 %v3796_v20, %v3541_v2  ;;  %v2443_v53 = vmul.f32 %v3796_v20, %v3545_v4  ;;  %v2446_v43 = vmul.f32 %v3796_v20, %v3561_v11 }
 0xd32   : > { %v3801_v38 = vld [vmem:[#allocation2 + $0x8] sm:$0xf]  ;;  %v2442_v34 = vmul.f32 %v2439_v13, %v3539_v0  ;;  %v2460_v51 = vrot.slane %v2439_v13, 4  ;;  %v2451_v42 = vmul.f32 %v2439_v13, %v3585_v22  ;;  %v2445_v40 = vmul.f32 %v2439_v13, %v3543_v3 }
 0xd33   : > { %2461 = vrot.lane.b32.xlu0 %v2458_v21, %s4001_s26  ;;  %v3109_v44 = vpack.i.bf16 %v2439_v13, %v3801_v38  ;;  %v2441_v45 = vmul.f32 %v3801_v38, %v3579_v17  ;;  %v2459_v50 = vrot.slane %v3801_v38, 4  ;;  %v2450_v17 = vmul.f32 %v3801_v38, %v3596_v28 }
 0xd34   : > { %v2444_v39 = vmul.f32 %v3801_v38, %v3559_v10  ;;  %v2487_v2 = vrot.slane %v2443_v53, 4  ;;  %v2447_v4 = vmul.f32 %v3801_v38, %v3572_v15  ;;  %v2448_v22 = vmul.f32 %v2439_v13, %v3563_v12 }
 0xd35   : > { %3110 = vrot.lane.b32.xlu1 %v3109_v44, %s4000_s19  ;;  %v3119_v41 = vpack.i.bf16 %v2442_v34, %v2441_v45  ;;  %v3129_v0 = vpack.i.bf16 %v2460_v51, %v2459_v50  ;;  %v3124_v54 = vpack.i.bf16 %v2451_v42, %v2450_v17  ;;  %v2489_v55 = vrot.slane %v2445_v40, 4  ;;  %s2824_s19 = sshll.u32 %s3375_s28, 7  ;;  %s3263_s28 = smov [#allocation3]  }
 0xd36   : > { %v2488_v28 = vrot.slane %v2444_v39, 4  ;;  %v2513_v10 = vrot.slane %v2446_v43, 4  ;;  %v2514_v3 = vrot.slane %v2447_v4, 4  ;;  %v2515_v58 = vrot.slane %v2448_v22, 4  ;;  %s3896_s4 = scalar_lea.hbm %s3955_s17, %s2824_s19 }
 0xd37   : > { %3120 = vrot.lane.b32.xlu0 %v3119_v41, %s3997_s0  ;;  %v2449_v12 = vmul.f32 %v3796_v20, %v3587_v23  ;;  %v2453_v15 = vmul.f32 %v3801_v38, %v3612_v36  ;;  %v2454_v33 = vmul.f32 %v2439_v13, %v3603_v31  ;;  %v2452_v48 = vmul.f32 %v3796_v20, %v3605_v32 }
 0xd38   : > { %v3134_v59 = vpack.i.bf16 %v2489_v55, %v2488_v28  ;;  %v3139_v11 = vpack.i.bf16 %v2515_v58, %v2514_v3  ;;  %v2438_v25 = vmul.f32 %v3801_v38, %v3525_v60  ;;  %v2437_v26 = vmul.f32 %v3796_v20, %v3527_v61 }
 0xd39   : > { %2474 = vrot.lane.b32.xlu1 %v2440_v52, %s3997_s0 }
 0xd3b   : > { %3130 = vrot.lane.b32.xlu0 %v3129_v0, %s3996_s29 }
 0xd3d   : > { %3115 = vrot.lane.b32.xlu1 %v3129_v0, %s4001_s26 }
 0xd3f   : > { %2490 = vrot.lane.b32.xlu0 %v2487_v2, %s4002_s23 }
 0xd41   : > { %3125 = vrot.lane.b32.xlu1 %v3124_v54, %s3993_s30 }
 0xd43   : > { %2516 = vrot.lane.b32.xlu0 %v2513_v10, %s3995_s18 }
 0xd45   : > { %3135 = vrot.lane.b32.xlu1 %v3134_v59, %s4002_s23 }
 0xd47   : > { %3140 = vrot.lane.b32.xlu0 %v3139_v11, %s3995_s18  ;;  %s3181_s18 = sshll.u32 %s3263_s28, 4  ;;  %s3182_s18 = int_to_ptr.vmem [resolvable:$false] %s3181_s18 }
 0xd49   : > { %2529 = vrot.lane.b32.xlu1 %v2449_v12, %s3993_s30  ;;  %v2568_v12 = vld [vmem:[%s3952_s14] sm:$0xf] }
 0xd4b   : > { %2539 = vrot.lane.b32.xlu0 %v2458_v21, %s3996_s29  ;;  %s3183_s29 = scalar_lea.vmem %s3182_s18, 256 }
 0xd4d   : > { %2554 = vrot.lane.b32.xlu1 %v2453_v15, %s3998_s21 }
 0xd4f   : > { %2556 = vrot.lane.b32.xlu0 %v2454_v33, %s3998_s21 }
 0xd51   : > { %2552 = vrot.lane.b32.xlu1 %v2452_v48, %s3998_s21  ;;  %s554_s21 = sand.u32 1, %s3231_s25  }
 0xd52   : > { %s2793_s22 = sshll.u32 %s554_s21, 3  ;;  %s2704_s5 = scalar_lea.sflag [#allocation4], %s554_s21 }
 0xd53   : > { %s556_s26 = scalar_lea.vmem [#allocation3], %s2793_s22 }
 0xd54   : > { %s2718_s23 = sshll.u32 %s556_s26, 4  ;;  %s3898_s23 = int_to_ptr.vmem [resolvable:$true] %s2718_s23 }
 0xd55   : > { %s3177_s30 = scalar_lea.vmem %s3898_s23, 128  ;;  %p3184_p0 = scmp.lt.s32.totalorder %s3898_s23, %s3182_s18 }
 0xd56   : > { %p3178_p11 = scmp.ne.s32.totalorder %s3898_s23, %s3177_s30  ;;  %p3185_p1 = scmp.lt.s32.totalorder %s3183_s29, %s3177_s30 }
 0xd58   : > { %p3179_p12 = pnand %p3178_p11, %p3392_p5  ;;  %p3186_p2 = por %p3185_p1, %p3184_p0 }
 0xd5a   : > { %p3180_p13 = pneg %p3179_p12 }
 0xd5c   : > { %p3187_p3 = pnand %p3186_p2, %p3180_p13 }
 0xda3   : > { %v2501_v57 = vpop.permute.xlu1 %2500 }
 0xda5   : > { %v2462_v23 = vpop.permute.xlu0 %2461 }
 0xda7   : > { %v3111_v46 = vpop.permute.xlu1 %3110 }
 0xda8   : > { %v3113_v5 = vunpack.i.h.bf16 %v3111_v46  ;;  %v3112_v1 = vunpack.i.l.bf16 %v3111_v46 }
 0xda9   : > { %v3121_v56 = vpop.permute.xlu0 %3120 }
 0xdaa   : > { %v3123_v7 = vunpack.i.h.bf16 %v3121_v56  ;;  %v3122_v8 = vunpack.i.l.bf16 %v3121_v56  ;;  %v2507_v27 = vsel %vm1577_vm4, %v3112_v1, %v3113_v5  ;;  %v2506_v43 = vsel %vm1577_vm4, %v2501_v57, %v3112_v1  ;;  %v2648_v56 = vld [vmem:[%s3953_s15] sm:$0xf] }
 0xdab   : > { %v2475_v47 = vpop.permute.xlu1 %2474 }
 0xdac   : > { %v2481_v37 = vsel %vm1553_vm3, %v3122_v8, %v3123_v7  ;;  %v2480_v24 = vsel %vm1553_vm3, %v2475_v47, %v3122_v8 }
 0xdad   : > { %v3131_v49 = vpop.permute.xlu0 %3130 }
 0xdae   : > { %v3133_v16 = vunpack.i.h.bf16 %v3131_v49  ;;  %v3132_v18 = vunpack.i.l.bf16 %v3131_v49 }
 0xdaf   : > { %v3116_v62 = vpop.permute.xlu1 %3115 }
 0xdb0   : > { %v3118_v6 = vunpack.i.h.bf16 %v3116_v62  ;;  %v3117_v31 = vunpack.i.l.bf16 %v3116_v62  ;;  %v2546_v44 = vsel %vm1615_vm5, %v3132_v18, %v3133_v16 }
 0xdb1   : > { %v2491_v63 = vpop.permute.xlu0 %2490 }
 0xdb2   : > { %v2468_v29 = vsel %vm1539_vm0, %v3117_v31, %v3118_v6  ;;  %v2467_v21 = vsel %vm1539_vm0, %v2462_v23, %v3117_v31 }
 0xdb3   : > { %v3126_v36 = vpop.permute.xlu1 %3125  ;;  %v2561_v41 = vsel %vm1430_vm11, %v2438_v25, %v2468_v29  ;;  %v2560_v42 = vsel %vm1430_vm11, %v2437_v26, %v2467_v21 }
 0xdb4   : > { %v3128_v9 = vunpack.i.h.bf16 %v3126_v36  ;;  %v3127_v14 = vunpack.i.l.bf16 %v3126_v36 }
 0xdb5   : > { %v2517_v32 = vpop.permute.xlu0 %2516 }
 0xdb6   : > { %v2536_v13 = vsel %vm1409_vm9, %v3127_v14, %v3128_v9 }
 0xdb7   : > { %v3136_v19 = vpop.permute.xlu1 %3135  ;;  %v2567_v2 = vsel %vm1430_vm11, %v2536_v13, %v2546_v44 }
 0xdb8   : > { %v3138_v30 = vunpack.i.h.bf16 %v3136_v19  ;;  %v3137_v35 = vunpack.i.l.bf16 %v3136_v19  ;;  %v2649_v19 = vld [vmem:[%s3954_s16] sm:$0xf] }
 0xdb9   : > { %v3141_v34 = vpop.permute.xlu0 %3140 }
 0xdba   : > { %v2496_v60 = vsel %vm1411_vm10, %v2491_v63, %v3137_v35  ;;  %v2497_v38 = vsel %vm1411_vm10, %v3137_v35, %v3138_v30  ;;  %v3143_v61 = vunpack.i.h.bf16 %v3141_v34  ;;  %v3142_v20 = vunpack.i.l.bf16 %v3141_v34 }
 0xdbb   : > { %v2530_v45 = vpop.permute.xlu1 %2529  ;;  %v2563_v50 = vsel %vm1430_vm11, %v2481_v37, %v2497_v38  ;;  %v2562_v51 = vsel %vm1430_vm11, %v2480_v24, %v2496_v60 }
 0xdbc   : > { %v2522_v52 = vsel %vm1591_vm1, %v2517_v32, %v3142_v20  ;;  %v2523_v0 = vsel %vm1591_vm1, %v3142_v20, %v3143_v61  ;;  %v2933_v53 = vpack.c.bf16 %v2563_v50, %v2561_v41  ;;  %v2935_v39 = vpack.c.bf16 %v2562_v51, %v2560_v42 }
 0xdbd   : > { %v2540_v17 = vpop.permute.xlu0 %2539  ;;  %v2565_v40 = vsel %vm1430_vm11, %v2507_v27, %v2523_v0  ;;  %v2535_v4 = vsel %vm1409_vm9, %v2530_v45, %v3127_v14  ;;  %v2564_v28 = vsel %vm1430_vm11, %v2506_v43, %v2522_v52 }
 0xdbe   : > { %v2545_v22 = vsel %vm1615_vm5, %v2540_v17, %v3132_v18  ;;  %2934 = vmatprep.subr.bf16.mxu1 %v2933_v53  ;;  %v2937_v54 = vpack.c.bf16 %v2567_v2, %v2565_v40 }
 0xdbf   : > { %v2566_v55 = vsel %vm1430_vm11, %v2535_v4, %v2545_v22  ;;  %v2555_v10 = vpop.permute.xlu1 %2554  ;;  %2936 = vmatpush1.bf16.msra.mxu1 %v2935_v39 }
 0xdc0   : > { %v2939_v3 = vpack.c.bf16 %v2566_v55, %v2564_v28  ;;  %2938 = vmatprep.subr.bf16.mxu1 %v2937_v54 }
 0xdc1   : > { %v2557_v58 = vpop.permute.xlu0 %2556 }
 0xdc2   : > { %v2559_v59 = vsel %vm1629_vm6, %v2555_v10, %v2557_v58 }
 0xdc3   : > { %v2553_v11 = vpop.permute.xlu1 %2552  ;;  %2940 = vmatpush1.bf16.msra.mxu1 %v2939_v3 }
 0xdc4   : > { %2814 = vmatprep.subr.msk.mxu1 %vm1430_vm11, %v2559_v59  ;;  %v2558_v15 = vsel %vm1629_vm6, %v2553_v11, %v2555_v10 }
 0xdc7   : > { %2815 = vmatpush1.msk.msra.mxu1 %vm1430_vm11, %v2558_v15 }
 0xdc8   : > { %2816 = vmatmul.mubr.msk.f32.vlgmr.msra.gmra.mrb[12].mxu1 %vm2569_vm2, %v2568_v12 }
 0xe9b   : > { %v2643_v33 = vpop.f32.mrb[12].mxu1 }
 0xe9c   : > { %v2650_v48 = vsel %vm1430_vm11, %v2643_v33, 0.0  ;;  %v2645_v57 = vpop.f32.mrb[13].mxu1 }
 0xe9d   : > { %v2651_v23 = vsel %vm1430_vm11, %v2645_v57, 0.0 }
 0xe9e   : > { %v2652_v46 = vadd.f32 %v2651_v23, %v2650_v48 }
 0xea0   : > { %2653 = vadd.xlane.f32.xlu0 %v2652_v46 }
 0xeb6   : > { %2686 = vperm.xlu0 %3037, %v2648_v56  }
 0xf2d   : > { %v2654_v47 = vpop.xlane.xlu0 %2653 }
 0xf2e   : > { %v2655_v49 = vsel %vm1430_vm11, %v2654_v47, 0.0 }
 0xf2f   : > { %v2656_v62 = vrot.slane %v2655_v49, 4 }
 0xf31   : > { %v2657_v63 = vadd.f32 %v2656_v62, %v2655_v49 }
 0xf33   : > { %v2658_v36 = vrot.slane %v2657_v63, 2 }
 0xf35   : > { %v2659_v5 = vadd.f32 %v2658_v36, %v2657_v63  ;;  %v2687_v61 = vpop.permute.xlu0 %2686 }
 0xf37   : > { %v2660_v1 = vrot.slane %v2659_v5, 1 }
 0xf39   : > { %v2661_v6 = vadd.f32 %v2660_v1, %v2659_v5 }
 0xf3b   : > { %v2662_v31 = vmul.f32 0.0009765625, %v2661_v6 }
 0xf3d   : > { %v2663_v7 = vsub.f32 %v2643_v33, %v2662_v31  ;;  %v2664_v8 = vsub.f32 %v2645_v57, %v2662_v31 }
 0xf3f   : > { %v2665_v9 = vmul.f32 %v2663_v7, %v2663_v7  ;;  %v2666_v14 = vmul.f32 %v2664_v8, %v2664_v8 }
 0xf41   : > { %v2667_v32 = vsel %vm1430_vm11, %v2665_v9, 0.0  ;;  %v2668_v16 = vsel %vm1430_vm11, %v2666_v14, 0.0 }
 0xf42   : > { %v2669_v18 = vadd.f32 %v2668_v16, %v2667_v32 }
 0xf44   : > { %2670 = vadd.xlane.f32.xlu1 %v2669_v18 }
 0xf55   : > { %2693 = vperm.xlu1 %3038, %v2649_v19  }
 0xfd1   : > { %v2671_v25 = vpop.xlane.xlu1 %2670 }
 0xfd2   : > { %v2672_v26 = vsel %vm1430_vm11, %v2671_v25, 0.0 }
 0xfd3   : > { %v2673_v27 = vrot.slane %v2672_v26, 4 }
 0xfd5   : > { %v2674_v29 = vadd.f32 %v2673_v27, %v2672_v26  ;;  %v2694_v45 = vpop.permute.xlu1 %2693 }
 0xfd7   : > { %v2675_v30 = vrot.slane %v2674_v29, 2 }
 0xfd9   : > { %v2676_v35 = vadd.f32 %v2675_v30, %v2674_v29 }
 0xfdb   : > { %v2677_v37 = vrot.slane %v2676_v35, 1 }
 0xfdd   : > { %v2678_v24 = vadd.f32 %v2677_v37, %v2676_v35 }
 0xfdf   : > { %v2679_v21 = vmul.f32 0.0009765625, %v2678_v24 }
 0xfe1   : > { %v2680_v13 = vadd.f32 1e-05, %v2679_v21 }
 0xfe3   : > { %3175 = vrsqrt.f32 %v2680_v13 }
 0xfed   : > { %v3176_v34 = vpop.eup %3175 }
 0xfee   : > { %v2682_v60 = vmul.f32 %v3176_v34, %v2663_v7  ;;  %v2683_v38 = vmul.f32 %v3176_v34, %v2664_v8 }
 0xff0   : > { %v2689_v20 = vmul.f32 %v2687_v61, %v2682_v60  ;;  %v2690_v44 = vmul.f32 %v2687_v61, %v2683_v38 }
 0xff2   : > { %v2696_v41 = vadd.f32 %v2694_v45, %v2689_v20  ;;  %v2697_v50 = vadd.f32 %v2694_v45, %v2690_v44 }
 0xff4   : > { %v2700_v51 = vcombine.low %v2696_v41, %v2697_v50 }
 0xff6   : > { %2702 = vst [vmem:[%s556_s26] sm:$0xff] %v2700_v51 }
 0xff7   : > { %3190 = shalt.err (!%p3187_p3)
}
 0xff8   : > { %s3191_s0 = scalar_lea.hbm %s3896_s4, 128  ;;  %s3195_s19 = scalar_lea.hbm %s3955_s17, 256 }
 0xff9   : > { %p3192_p4 = scmp.ne.s32.totalorder %s3896_s4, %s3191_s0  ;;  %p3196_p9 = scmp.lt.u32.totalorder %s3896_s4, %s3955_s17 }
 0xffa   : > { %p3197_p10 = scmp.lt.u32.totalorder %s3195_s19, %s3191_s0  ;;  %p3199_p12 = scmp.lt.u32.totalorder %s3191_s0, %s3896_s4 }
 0xffb   : > { %p3193_p7 = pnand %p3192_p4, %p3392_p5 }
 0xffc   : > { %p3198_p11 = por %p3197_p10, %p3196_p9 }
 0xffd   : > { %p3194_p8 = pneg %p3193_p7 }
 0xffe   : > { %p3200_p13 = por %p3199_p12, %p3198_p11 }
0x1000   : > { %p3201_p0 = pnand %p3200_p13, %p3194_p8 }
0x1002   : > { %3204 = shalt.err (!%p3201_p0)
}
0x1003   : > { %2941 = dma.vmem_to_hbm [thread:$0]  (%p3392_p5), %s3898_s23, 128, %s3896_s4, %s2704_s5  }
0x1004 PF: > { %p2947_p1 = scmp.ge.s32.totalorder %s3239_s27, 2  ;;  %s2730_s3 = sand.u32 1, %s3227_s24  }
0x1005   : > { %s2731_s30 = scalar_lea.sflag [#allocation4], %s2730_s3 }
0x1006   : > { %p2944_p2 = pnand %p2947_p1, %p3396_p6 }
0x1008   : > { %3222 = dma.done.wait (!%p2944_p2), %s2731_s30, 128  }
0x1009   : > { %3224 = vsyncadd (!%p2944_p2), %s2731_s30, 4294967168  ;;  %s4003_s27 = sld [smem:[#allocation7_spill]]  ;;  %s4004_s28 = sld [smem:[#allocation6_spill]] }
0x100a   : > { %s4005_s26 = sld [smem:[#allocation8_spill]]  ;;  %s4006_s24 = smov %s3231_s25 }
0x100f   : > { %p27_p3 = scmp.ge.s32.totalorder %s4003_s27, 4   ;;  %s4007_s25 = smov %s4004_s28 }
0x1011   :  { %29 = sbr.rel (!%p27_p3) target bundleno = 10 (0xa), region = 127 }
0x1018   :  { %2736 = vsyncpa [#allocation4], 1 }
0x1019   :  { %2738 = vsyncpa [#allocation4 + $0x1], 1 }

</bundles_post_ra>
